<compile_context>
chip_gen: v5e
topology: v5e:2x2
jax: 0.10.0
libtpu: 0.0.40
codegen_flags: <defaults>
</compile_context>

<pallas_src>
import jax
import jax.numpy as jnp
from jax.experimental import pallas as pl
from jax.experimental.pallas import tpu as pltpu

# ----------------------------- model config ---------------------------------
INPUT_DIM = 16           # input_dim
CONTEXT_DIM = 32         # context_dim (LSTM hidden size H); 4H == 128 lanes
NUM_LAYERS = 2
HIDDEN_MLP = 128
BATCH = 2
SEQ = 8
LSTM_IN = INPUT_DIM + 1  # history features = input_dim + 1

H = CONTEXT_DIM
G = 4 * H                # 128: LSTM gate width == MLP width == lane width

# ---- row offsets inside the packed bf16 weight slab (all multiples of 16) ---
OFF_WIH0 = 0      # (LSTM_IN, G)   rows 0..16 used, block padded to 32
OFF_WHH0 = 32     # (H, G)
OFF_W1I = 64      # (H, G)  layer-1 W_ih (kept split: no [x; h] concat)
OFF_W1H = 96      # (H, G)  layer-1 W_hh
OFF_W1P = 128     # (INPUT_DIM, G)  MLP layer-1 rows that multiply `params`
OFF_W1C = 144     # (H, G)          MLP layer-1 rows that multiply `context`
OFF_W2 = 176      # (G, G)
OFF_W3 = 304      # (G, G)  (only first INPUT_DIM output lanes are real)
W_SLAB_ROWS = 432

# ---- rows inside the f32 bias slab ----
ROW_B0, ROW_B1, ROW_BM1, ROW_BM2, ROW_BM3 = 0, 1, 2, 3, 4
B_SLAB_ROWS = 8


# --------------------------- fused Pallas kernel -----------------------------
def _fused_update_kernel(p_ref, hist_ref, h0_ref, c0_ref, w_ref, b_ref,
                         upd_ref, hn_ref, cn_ref, gx_scr):
    """Whole UpdateNetwork.forward in one kernel.

    p_ref   : (B, INPUT_DIM)            f32
    hist_ref: (B, T, LSTM_IN)           f32 (batch-first, as PyTorch gives it)
    h0/c0   : (NUM_LAYERS, B, H)        f32
    w_ref   : (W_SLAB_ROWS, G)          bf16 packed weight slab (gate-scaled)
    b_ref   : (B_SLAB_ROWS, G)          f32 packed bias slab   (gate-scaled)
    outputs : update (B, INPUT_DIM), h_n / c_n (NUM_LAYERS, B, H)
    gx_scr  : VMEM scratch (B, T, G) for the hoisted layer-0 input projection.
    Gate order is PyTorch's [i, f, g, o].
    """
    B, T, F = hist_ref.shape

    # Static (zero-cost) slices of the packed bf16 weight slab.
    whh0 = w_ref[OFF_WHH0:OFF_WHH0 + H, :]
    w1i = w_ref[OFF_W1I:OFF_W1I + H, :]
    w1h = w_ref[OFF_W1H:OFF_W1H + H, :]

    # Hoist the loop-invariant bias broadcast (JAX does not CSE broadcasts).
    b1 = jnp.broadcast_to(b_ref[ROW_B1:ROW_B1 + 1, :], (B, G))

    # Hoist layer-0's input projection out of the recurrence: one
    # (B*T, F) @ (F, 4H) bf16 MXU matmul (bias folded in), parked in VMEM
    # scratch so it is not pinned in vregs for the whole unrolled loop.
    x = hist_ref[...].reshape(B * T, F).astype(jnp.bfloat16)
    gx = jnp.dot(x, w_ref[OFF_WIH0:OFF_WIH0 + F, :],
                 preferred_element_type=jnp.float32)
    gx_scr[...] = (gx + b_ref[ROW_B0:ROW_B0 + 1, :]).reshape(B, T, G)

    def gate_act(g):
        # i/f/o columns (and their biases) were pre-scaled by 0.5 at pack time,
        # so a single tanh pass yields sigmoid via 0.5*tanh(x/2)+0.5 (VALU FMA).
        t = jnp.tanh(g)                       # one full-vreg EUP pass
        i = 0.5 * t[:, 0 * H:1 * H] + 0.5
        f = 0.5 * t[:, 1 * H:2 * H] + 0.5
        gg = t[:, 2 * H:3 * H]
        o = 0.5 * t[:, 3 * H:4 * H] + 0.5
        return i, f, gg, o

    h1, c1 = h0_ref[0], c0_ref[0]
    h2, c2 = h0_ref[1], c0_ref[1]

    # T is small and static: fully unroll so the scheduler can overlap
    # layer-1's recurrent matmul (depends only on previous-step h2) with
    # layer-0's matmul/activations of the same step.
    for t in range(T):
        # layer-1 recurrent part: only needs previous-step h2 -> off critical path
        g1h = jnp.dot(h2.astype(jnp.bfloat16), w1h,
                      preferred_element_type=jnp.float32)
        # ---- layer 0: only the recurrent matmul remains per step ----
        g0 = gx_scr[:, t, :] + jnp.dot(h1.astype(jnp.bfloat16), whh0,
                                       preferred_element_type=jnp.float32)
        i0, f0, gg0, o0 = gate_act(g0)
        c1 = f0 * c1 + i0 * gg0
        h1 = o0 * jnp.tanh(c1)
        # ---- layer 1: split weights, no [x; h] concat anywhere ----
        g1 = g1h + jnp.dot(h1.astype(jnp.bfloat16), w1i,
                           preferred_element_type=jnp.float32) + b1
        i1, f1, gg1, o1 = gate_act(g1)
        c2 = f1 * c2 + i1 * gg1
        h2 = o1 * jnp.tanh(c2)

    hn_ref[0, :, :] = h1
    hn_ref[1, :, :] = h2
    cn_ref[0, :, :] = c1
    cn_ref[1, :, :] = c2

    # ---- update_generator MLP; concat([params, context]) folded into a
    #      row-split first layer (no concatenate anywhere) ----
    m = (jnp.dot(p_ref[...].astype(jnp.bfloat16),
                 w_ref[OFF_W1P:OFF_W1P + INPUT_DIM, :],
                 preferred_element_type=jnp.float32)
         + jnp.dot(h2.astype(jnp.bfloat16),
                   w_ref[OFF_W1C:OFF_W1C + H, :],
                   preferred_element_type=jnp.float32)
         + b_ref[ROW_BM1:ROW_BM1 + 1, :])
    m = jnp.maximum(m, 0.0)
    m = jnp.dot(m.astype(jnp.bfloat16), w_ref[OFF_W2:OFF_W2 + HIDDEN_MLP, :],
                preferred_element_type=jnp.float32) + b_ref[ROW_BM2:ROW_BM2 + 1, :]
    m = jnp.maximum(m, 0.0)
    y = jnp.tanh(jnp.dot(m.astype(jnp.bfloat16),
                         w_ref[OFF_W3:OFF_W3 + HIDDEN_MLP, :],
                         preferred_element_type=jnp.float32)
                 + b_ref[ROW_BM3:ROW_BM3 + 1, :])
    upd_ref[...] = y[:, :INPUT_DIM] * 0.1


# ----------------------------- wrapper ---------------------------------------
_VMEM = pl.BlockSpec(memory_space=pltpu.MemorySpace.VMEM)


@jax.jit
def update_network_forward(p, history, h0, c0, w_slab, b_slab):
    """Mirrors UpdateNetwork.forward(params, history, hidden). hidden=None -> zero h0/c0."""
    B = p.shape[0]
    T = history.shape[1]
    out_shape = (jax.ShapeDtypeStruct((B, INPUT_DIM), jnp.float32),
                 jax.ShapeDtypeStruct((NUM_LAYERS, B, H), jnp.float32),
                 jax.ShapeDtypeStruct((NUM_LAYERS, B, H), jnp.float32))
    upd, h_n, c_n = pl.pallas_call(
        _fused_update_kernel,
        out_shape=out_shape,
        in_specs=[_VMEM] * 6,
        out_specs=(_VMEM, _VMEM, _VMEM),
        scratch_shapes=[pltpu.VMEM((B, T, G), jnp.float32)],
    )(p, history, h0, c0, w_slab, b_slab)
    return upd, (h_n, c_n)


# --------------------- canonical (PyTorch-layout) init ------------------------
def init_weights(key):
    """Canonical weights in PyTorch layout: W (out, in), separate b_ih/b_hh."""
    ks = jax.random.split(key, 14)

    def u(k, shape, bound):
        return jax.random.uniform(k, shape, jnp.float32, -bound, bound)

    kl = 1.0 / (H ** 0.5)
    k1 = 1.0 / ((INPUT_DIM + H) ** 0.5)
    k2 = 1.0 / (HIDDEN_MLP ** 0.5)
    w = {}
    # LSTM layer 0 (input LSTM_IN); gates stacked as [i, f, g, o]
    w["w_ih_l0"] = u(ks[0], (G, LSTM_IN), kl)
    w["w_hh_l0"] = u(ks[1], (G, H), kl)
    w["b_ih_l0"] = u(ks[2], (G,), kl)
    w["b_hh_l0"] = u(ks[3], (G,), kl)
    # LSTM layer 1 (input H)
    w["w_ih_l1"] = u(ks[4], (G, H), kl)
    w["w_hh_l1"] = u(ks[5], (G, H), kl)
    w["b_ih_l1"] = u(ks[6], (G,), kl)
    w["b_hh_l1"] = u(ks[7], (G,), kl)
    # update_generator MLP
    w["mlp_w1"] = u(ks[8], (HIDDEN_MLP, INPUT_DIM + H), k1)
    w["mlp_b1"] = u(ks[9], (HIDDEN_MLP,), k1)
    w["mlp_w2"] = u(ks[10], (HIDDEN_MLP, HIDDEN_MLP), k2)
    w["mlp_b2"] = u(ks[11], (HIDDEN_MLP,), k2)
    w["mlp_w3"] = u(ks[12], (INPUT_DIM, HIDDEN_MLP), k2)
    w["mlp_b3"] = u(ks[13], (INPUT_DIM,), k2)
    return w


def pack_weights(w):
    """Repack canonical weights into the two kernel slabs.

    * transpose to (in, out) so every in-kernel op is a plain row-major matmul
    * fold b_ih + b_hh
    * pre-scale i/f/o gate columns and biases by 0.5 (tanh-only sigmoid trick;
      0.5 is exact in bf16)
    * pad blocks to 16-row aligned offsets; pad the last MLP layer to 128 lanes
    * weights -> bf16 (MXU operands), biases -> f32
    """
    gs = jnp.concatenate([jnp.full((H,), 0.5), jnp.full((H,), 0.5),
                          jnp.ones((H,)), jnp.full((H,), 0.5)]).astype(jnp.float32)

    def pad_rows(a, rows):
        return jnp.pad(a, ((0, rows - a.shape[0]), (0, 0)))

    wih0_t = w["w_ih_l0"].T * gs                                  # (17, 128)
    whh0_t = w["w_hh_l0"].T * gs                                  # (32, 128)
    w1i_t = w["w_ih_l1"].T * gs                                   # (32, 128)
    w1h_t = w["w_hh_l1"].T * gs                                   # (32, 128)
    w1_t = w["mlp_w1"].T                                          # (48, 128)
    w2_t = w["mlp_w2"].T                                          # (128, 128)
    w3_t = jnp.pad(w["mlp_w3"].T, ((0, 0), (0, G - INPUT_DIM)))   # (128, 128)

    w_slab = jnp.concatenate([
        pad_rows(wih0_t, 32),        # OFF_WIH0
        whh0_t,                      # OFF_WHH0
        w1i_t,                       # OFF_W1I
        w1h_t,                       # OFF_W1H
        w1_t[:INPUT_DIM],            # OFF_W1P
        w1_t[INPUT_DIM:],            # OFF_W1C
        w2_t,                        # OFF_W2
        w3_t,                        # OFF_W3
    ], axis=0).astype(jnp.bfloat16)
    assert w_slab.shape == (W_SLAB_ROWS, G)

    b0 = ((w["b_ih_l0"] + w["b_hh_l0"]) * gs)[None, :]
    b1 = ((w["b_ih_l1"] + w["b_hh_l1"]) * gs)[None, :]
    bm1 = w["mlp_b1"][None, :]
    bm2 = w["mlp_b2"][None, :]
    bm3 = jnp.pad(w["mlp_b3"], (0, G - INPUT_DIM))[None, :]
    b_slab = jnp.concatenate(
        [b0, b1, bm1, bm2, bm3, jnp.zeros((B_SLAB_ROWS - 5, G))],
        axis=0).astype(jnp.float32)
    assert b_slab.shape == (B_SLAB_ROWS, G)
    return w_slab, b_slab


# ------------------------- pure-JAX reference --------------------------------
def reference_forward(p, history, h0, c0, w):
    """Straight transcription of the PyTorch module using the canonical weights."""
    def cell(x, h, c, wih, whh, bih, bhh):
        g = x @ wih.T + h @ whh.T + bih + bhh
        i = jax.nn.sigmoid(g[:, :H])
        f = jax.nn.sigmoid(g[:, H:2 * H])
        gg = jnp.tanh(g[:, 2 * H:3 * H])
        o = jax.nn.sigmoid(g[:, 3 * H:])
        c_new = f * c + i * gg
        return o * jnp.tanh(c_new), c_new

    h1, c1, h2, c2 = h0[0], c0[0], h0[1], c0[1]
    for t in range(history.shape[1]):
        x = history[:, t, :]
        h1, c1 = cell(x, h1, c1, w["w_ih_l0"], w["w_hh_l0"], w["b_ih_l0"], w["b_hh_l0"])
        h2, c2 = cell(h1, h2, c2, w["w_ih_l1"], w["w_hh_l1"], w["b_ih_l1"], w["b_hh_l1"])
    context = h2
    x = jnp.concatenate([p, context], axis=-1)
    x = jnp.maximum(x @ w["mlp_w1"].T + w["mlp_b1"], 0.0)
    x = jnp.maximum(x @ w["mlp_w2"].T + w["mlp_b2"], 0.0)
    upd = jnp.tanh(x @ w["mlp_w3"].T + w["mlp_b3"]) * 0.1
    return upd, (jnp.stack([h1, h2]), jnp.stack([c1, c2]))


# --------------------------------- main ---------------------------------------
if __name__ == "__main__":
    key = jax.random.PRNGKey(0)
    k_w, k_p, k_h = jax.random.split(key, 3)

    weights = init_weights(k_w)
    # Pack once; keep resident across calls when this forward is used repeatedly.
    w_slab, b_slab = pack_weights(weights)

    params = jax.random.normal(k_p, (BATCH, INPUT_DIM), jnp.float32)
    history = jax.random.normal(k_h, (BATCH, SEQ, LSTM_IN), jnp.float32)
    # hidden=None in the PyTorch module -> zero initial state
    h0 = jnp.zeros((NUM_LAYERS, BATCH, CONTEXT_DIM), jnp.float32)
    c0 = jnp.zeros((NUM_LAYERS, BATCH, CONTEXT_DIM), jnp.float32)

    update, (h_n, c_n) = update_network_forward(params, history, h0, c0, w_slab, b_slab)
    jax.block_until_ready((update, h_n, c_n))

    ref_update, (ref_h, ref_c) = reference_forward(params, history, h0, c0, weights)

    assert update.shape == (BATCH, INPUT_DIM)
    assert h_n.shape == (NUM_LAYERS, BATCH, CONTEXT_DIM)
    assert c_n.shape == (NUM_LAYERS, BATCH, CONTEXT_DIM)
    # bf16 matmul operands (f32 accumulation) -> slightly looser state tolerance.
    assert jnp.allclose(update, ref_update, rtol=5e-3, atol=5e-3)
    assert jnp.allclose(h_n, ref_h, rtol=1e-2, atol=1e-2)
    assert jnp.allclose(c_n, ref_c, rtol=1e-2, atol=1e-2)

    print("KERNEL_OK")
</pallas_src>

<mosaic_0001>
module attributes {stable_mosaic.version = 11 : i64} {
  func.func @_fused_update_kernel(%arg0: memref<2x16xf32, #tpu.memory_space<vmem>>, %arg1: memref<2x8x17xf32, #tpu.memory_space<vmem>>, %arg2: memref<2x2x32xf32, #tpu.memory_space<vmem>>, %arg3: memref<2x2x32xf32, #tpu.memory_space<vmem>>, %arg4: memref<432x128xbf16, #tpu.memory_space<vmem>>, %arg5: memref<8x128xf32, #tpu.memory_space<vmem>>, %arg6: memref<2x16xf32, #tpu.memory_space<vmem>>, %arg7: memref<2x2x32xf32, #tpu.memory_space<vmem>>, %arg8: memref<2x2x32xf32, #tpu.memory_space<vmem>>, %arg9: memref<2x8x128xf32, #tpu.memory_space<vmem>>) attributes {dimension_semantics = [], scalar_prefetch = 0 : i64, scratch_operands = 1 : i64, tpu.core_type = #tpu.core_type<tc>} {
    %c32 = arith.constant 32 : index
    %c0 = arith.constant 0 : index
    %0 = vector.load %arg4[%c32, %c0] : memref<432x128xbf16, #tpu.memory_space<vmem>>, vector<32x128xbf16>
    %c64 = arith.constant 64 : index
    %c0_0 = arith.constant 0 : index
    %1 = vector.load %arg4[%c64, %c0_0] : memref<432x128xbf16, #tpu.memory_space<vmem>>, vector<32x128xbf16>
    %c96 = arith.constant 96 : index
    %c0_1 = arith.constant 0 : index
    %2 = vector.load %arg4[%c96, %c0_1] : memref<432x128xbf16, #tpu.memory_space<vmem>>, vector<32x128xbf16>
    %c1 = arith.constant 1 : index
    %c0_2 = arith.constant 0 : index
    %3 = vector.load %arg5[%c1, %c0_2] : memref<8x128xf32, #tpu.memory_space<vmem>>, vector<1x128xf32>
    %4 = vector.shape_cast %3 : vector<1x128xf32> to vector<1x128xf32>
    %5 = vector.broadcast %4 : vector<1x128xf32> to vector<2x128xf32>
    %c0_3 = arith.constant 0 : index
    %c0_4 = arith.constant 0 : index
    %c0_5 = arith.constant 0 : index
    %6 = vector.load %arg1[%c0_3, %c0_4, %c0_5] : memref<2x8x17xf32, #tpu.memory_space<vmem>>, vector<2x8x17xf32>
    %7 = vector.shape_cast %6 : vector<2x8x17xf32> to vector<16x17xf32>
    %8 = arith.truncf %7 : vector<16x17xf32> to vector<16x17xbf16>
    %c0_6 = arith.constant 0 : index
    %c0_7 = arith.constant 0 : index
    %9 = vector.load %arg4[%c0_6, %c0_7] : memref<432x128xbf16, #tpu.memory_space<vmem>>, vector<17x128xbf16>
    %cst = arith.constant dense<0.000000e+00> : vector<16x128xf32>
    %10 = tpu.matmul %8, %9, %cst {dimension_numbers = #tpu.dot_dimension_numbers<[1], [0], [0], [1], [0, 0, 1, 1], [], []>} : vector<16x17xbf16>, vector<17x128xbf16>, vector<16x128xf32> -> vector<16x128xf32>
    %c0_8 = arith.constant 0 : index
    %c0_9 = arith.constant 0 : index
    %11 = vector.load %arg5[%c0_8, %c0_9] : memref<8x128xf32, #tpu.memory_space<vmem>>, vector<1x128xf32>
    %12 = vector.broadcast %11 : vector<1x128xf32> to vector<16x128xf32>
    %13 = arith.addf %10, %12 : vector<16x128xf32>
    %14 = vector.shape_cast %13 : vector<16x128xf32> to vector<2x8x128xf32>
    %c0_10 = arith.constant 0 : index
    %c0_11 = arith.constant 0 : index
    %c0_12 = arith.constant 0 : index
    %15 = vector.load %arg9[%c0_10, %c0_11, %c0_12] : memref<2x8x128xf32, #tpu.memory_space<vmem>>, vector<2x8x128xf32>
    tpu.vector_store %arg9[%c0_10, %c0_11, %c0_12], %14 {strides = array<i32>} : memref<2x8x128xf32, #tpu.memory_space<vmem>>, vector<2x8x128xf32>,
    %c0_13 = arith.constant 0 : index
    %c0_14 = arith.constant 0 : index
    %c0_15 = arith.constant 0 : index
    %16 = vector.load %arg2[%c0_13, %c0_14, %c0_15] : memref<2x2x32xf32, #tpu.memory_space<vmem>>, vector<1x2x32xf32>
    %17 = vector.shape_cast %16 : vector<1x2x32xf32> to vector<2x32xf32>
    %c0_16 = arith.constant 0 : index
    %c0_17 = arith.constant 0 : index
    %c0_18 = arith.constant 0 : index
    %18 = vector.load %arg3[%c0_16, %c0_17, %c0_18] : memref<2x2x32xf32, #tpu.memory_space<vmem>>, vector<1x2x32xf32>
    %19 = vector.shape_cast %18 : vector<1x2x32xf32> to vector<2x32xf32>
    %c1_19 = arith.constant 1 : index
    %c0_20 = arith.constant 0 : index
    %c0_21 = arith.constant 0 : index
    %20 = vector.load %arg2[%c1_19, %c0_20, %c0_21] : memref<2x2x32xf32, #tpu.memory_space<vmem>>, vector<1x2x32xf32>
    %21 = vector.shape_cast %20 : vector<1x2x32xf32> to vector<2x32xf32>
    %c1_22 = arith.constant 1 : index
    %c0_23 = arith.constant 0 : index
    %c0_24 = arith.constant 0 : index
    %22 = vector.load %arg3[%c1_22, %c0_23, %c0_24] : memref<2x2x32xf32, #tpu.memory_space<vmem>>, vector<1x2x32xf32>
    %23 = vector.shape_cast %22 : vector<1x2x32xf32> to vector<2x32xf32>
    %24 = arith.truncf %21 : vector<2x32xf32> to vector<2x32xbf16>
    %cst_25 = arith.constant dense<0.000000e+00> : vector<2x128xf32>
    %25 = tpu.matmul %24, %2, %cst_25 {dimension_numbers = #tpu.dot_dimension_numbers<[1], [0], [0], [1], [0, 0, 1, 1], [], []>} : vector<2x32xbf16>, vector<32x128xbf16>, vector<2x128xf32> -> vector<2x128xf32>
    %c0_26 = arith.constant 0 : index
    %c0_27 = arith.constant 0 : index
    %c0_28 = arith.constant 0 : index
    %26 = vector.load %arg9[%c0_26, %c0_27, %c0_28] : memref<2x8x128xf32, #tpu.memory_space<vmem>>, vector<2x1x128xf32>
    %27 = vector.shape_cast %26 : vector<2x1x128xf32> to vector<2x128xf32>
    %28 = arith.truncf %17 : vector<2x32xf32> to vector<2x32xbf16>
    %cst_29 = arith.constant dense<0.000000e+00> : vector<2x128xf32>
    %29 = tpu.matmul %28, %0, %cst_29 {dimension_numbers = #tpu.dot_dimension_numbers<[1], [0], [0], [1], [0, 0, 1, 1], [], []>} : vector<2x32xbf16>, vector<32x128xbf16>, vector<2x128xf32> -> vector<2x128xf32>
    %30 = arith.addf %27, %29 : vector<2x128xf32>
    %31 = math.tanh %30 : vector<2x128xf32>
    %32 = vector.extract_strided_slice %31 {offsets = [0, 0], sizes = [2, 32], strides = [1, 1]} : vector<2x128xf32> to vector<2x32xf32>
    %cst_30 = arith.constant 5.000000e-01 : f32
    %33 = vector.broadcast %cst_30 : f32 to vector<2x32xf32>
    %34 = arith.mulf %33, %32 : vector<2x32xf32>
    %cst_31 = arith.constant 5.000000e-01 : f32
    %35 = vector.broadcast %cst_31 : f32 to vector<2x32xf32>
    %36 = arith.addf %34, %35 : vector<2x32xf32>
    %37 = vector.extract_strided_slice %31 {offsets = [0, 32], sizes = [2, 32], strides = [1, 1]} : vector<2x128xf32> to vector<2x32xf32>
    %cst_32 = arith.constant 5.000000e-01 : f32
    %38 = vector.broadcast %cst_32 : f32 to vector<2x32xf32>
    %39 = arith.mulf %38, %37 : vector<2x32xf32>
    %cst_33 = arith.constant 5.000000e-01 : f32
    %40 = vector.broadcast %cst_33 : f32 to vector<2x32xf32>
    %41 = arith.addf %39, %40 : vector<2x32xf32>
    %42 = vector.extract_strided_slice %31 {offsets = [0, 64], sizes = [2, 32], strides = [1, 1]} : vector<2x128xf32> to vector<2x32xf32>
    %43 = vector.extract_strided_slice %31 {offsets = [0, 96], sizes = [2, 32], strides = [1, 1]} : vector<2x128xf32> to vector<2x32xf32>
    %cst_34 = arith.constant 5.000000e-01 : f32
    %44 = vector.broadcast %cst_34 : f32 to vector<2x32xf32>
    %45 = arith.mulf %44, %43 : vector<2x32xf32>
    %cst_35 = arith.constant 5.000000e-01 : f32
    %46 = vector.broadcast %cst_35 : f32 to vector<2x32xf32>
    %47 = arith.addf %45, %46 : vector<2x32xf32>
    %48 = arith.mulf %41, %19 : vector<2x32xf32>
    %49 = arith.mulf %36, %42 : vector<2x32xf32>
    %50 = arith.addf %48, %49 : vector<2x32xf32>
    %51 = math.tanh %50 : vector<2x32xf32>
    %52 = arith.mulf %47, %51 : vector<2x32xf32>
    %53 = arith.truncf %52 : vector<2x32xf32> to vector<2x32xbf16>
    %cst_36 = arith.constant dense<0.000000e+00> : vector<2x128xf32>
    %54 = tpu.matmul %53, %1, %cst_36 {dimension_numbers = #tpu.dot_dimension_numbers<[1], [0], [0], [1], [0, 0, 1, 1], [], []>} : vector<2x32xbf16>, vector<32x128xbf16>, vector<2x128xf32> -> vector<2x128xf32>
    %55 = arith.addf %25, %54 : vector<2x128xf32>
    %56 = arith.addf %55, %5 : vector<2x128xf32>
    %57 = math.tanh %56 : vector<2x128xf32>
    %58 = vector.extract_strided_slice %57 {offsets = [0, 0], sizes = [2, 32], strides = [1, 1]} : vector<2x128xf32> to vector<2x32xf32>
    %cst_37 = arith.constant 5.000000e-01 : f32
    %59 = vector.broadcast %cst_37 : f32 to vector<2x32xf32>
    %60 = arith.mulf %59, %58 : vector<2x32xf32>
    %cst_38 = arith.constant 5.000000e-01 : f32
    %61 = vector.broadcast %cst_38 : f32 to vector<2x32xf32>
    %62 = arith.addf %60, %61 : vector<2x32xf32>
    %63 = vector.extract_strided_slice %57 {offsets = [0, 32], sizes = [2, 32], strides = [1, 1]} : vector<2x128xf32> to vector<2x32xf32>
    %cst_39 = arith.constant 5.000000e-01 : f32
    %64 = vector.broadcast %cst_39 : f32 to vector<2x32xf32>
    %65 = arith.mulf %64, %63 : vector<2x32xf32>
    %cst_40 = arith.constant 5.000000e-01 : f32
    %66 = vector.broadcast %cst_40 : f32 to vector<2x32xf32>
    %67 = arith.addf %65, %66 : vector<2x32xf32>
    %68 = vector.extract_strided_slice %57 {offsets = [0, 64], sizes = [2, 32], strides = [1, 1]} : vector<2x128xf32> to vector<2x32xf32>
    %69 = vector.extract_strided_slice %57 {offsets = [0, 96], sizes = [2, 32], strides = [1, 1]} : vector<2x128xf32> to vector<2x32xf32>
    %cst_41 = arith.constant 5.000000e-01 : f32
    %70 = vector.broadcast %cst_41 : f32 to vector<2x32xf32>
    %71 = arith.mulf %70, %69 : vector<2x32xf32>
    %cst_42 = arith.constant 5.000000e-01 : f32
    %72 = vector.broadcast %cst_42 : f32 to vector<2x32xf32>
    %73 = arith.addf %71, %72 : vector<2x32xf32>
    %74 = arith.mulf %67, %23 : vector<2x32xf32>
    %75 = arith.mulf %62, %68 : vector<2x32xf32>
    %76 = arith.addf %74, %75 : vector<2x32xf32>
    %77 = math.tanh %76 : vector<2x32xf32>
    %78 = arith.mulf %73, %77 : vector<2x32xf32>
    %79 = arith.truncf %78 : vector<2x32xf32> to vector<2x32xbf16>
    %cst_43 = arith.constant dense<0.000000e+00> : vector<2x128xf32>
    %80 = tpu.matmul %79, %2, %cst_43 {dimension_numbers = #tpu.dot_dimension_numbers<[1], [0], [0], [1], [0, 0, 1, 1], [], []>} : vector<2x32xbf16>, vector<32x128xbf16>, vector<2x128xf32> -> vector<2x128xf32>
    %c0_44 = arith.constant 0 : index
    %c1_45 = arith.constant 1 : index
    %c0_46 = arith.constant 0 : index
    %81 = vector.load %arg9[%c0_44, %c1_45, %c0_46] : memref<2x8x128xf32, #tpu.memory_space<vmem>>, vector<2x1x128xf32>
    %82 = vector.shape_cast %81 : vector<2x1x128xf32> to vector<2x128xf32>
    %83 = arith.truncf %52 : vector<2x32xf32> to vector<2x32xbf16>
    %cst_47 = arith.constant dense<0.000000e+00> : vector<2x128xf32>
    %84 = tpu.matmul %83, %0, %cst_47 {dimension_numbers = #tpu.dot_dimension_numbers<[1], [0], [0], [1], [0, 0, 1, 1], [], []>} : vector<2x32xbf16>, vector<32x128xbf16>, vector<2x128xf32> -> vector<2x128xf32>
    %85 = arith.addf %82, %84 : vector<2x128xf32>
    %86 = math.tanh %85 : vector<2x128xf32>
    %87 = vector.extract_strided_slice %86 {offsets = [0, 0], sizes = [2, 32], strides = [1, 1]} : vector<2x128xf32> to vector<2x32xf32>
    %cst_48 = arith.constant 5.000000e-01 : f32
    %88 = vector.broadcast %cst_48 : f32 to vector<2x32xf32>
    %89 = arith.mulf %88, %87 : vector<2x32xf32>
    %cst_49 = arith.constant 5.000000e-01 : f32
    %90 = vector.broadcast %cst_49 : f32 to vector<2x32xf32>
    %91 = arith.addf %89, %90 : vector<2x32xf32>
    %92 = vector.extract_strided_slice %86 {offsets = [0, 32], sizes = [2, 32], strides = [1, 1]} : vector<2x128xf32> to vector<2x32xf32>
    %cst_50 = arith.constant 5.000000e-01 : f32
    %93 = vector.broadcast %cst_50 : f32 to vector<2x32xf32>
    %94 = arith.mulf %93, %92 : vector<2x32xf32>
    %cst_51 = arith.constant 5.000000e-01 : f32
    %95 = vector.broadcast %cst_51 : f32 to vector<2x32xf32>
    %96 = arith.addf %94, %95 : vector<2x32xf32>
    %97 = vector.extract_strided_slice %86 {offsets = [0, 64], sizes = [2, 32], strides = [1, 1]} : vector<2x128xf32> to vector<2x32xf32>
    %98 = vector.extract_strided_slice %86 {offsets = [0, 96], sizes = [2, 32], strides = [1, 1]} : vector<2x128xf32> to vector<2x32xf32>
    %cst_52 = arith.constant 5.000000e-01 : f32
    %99 = vector.broadcast %cst_52 : f32 to vector<2x32xf32>
    %100 = arith.mulf %99, %98 : vector<2x32xf32>
    %cst_53 = arith.constant 5.000000e-01 : f32
    %101 = vector.broadcast %cst_53 : f32 to vector<2x32xf32>
    %102 = arith.addf %100, %101 : vector<2x32xf32>
    %103 = arith.mulf %96, %50 : vector<2x32xf32>
    %104 = arith.mulf %91, %97 : vector<2x32xf32>
    %105 = arith.addf %103, %104 : vector<2x32xf32>
    %106 = math.tanh %105 : vector<2x32xf32>
    %107 = arith.mulf %102, %106 : vector<2x32xf32>
    %108 = arith.truncf %107 : vector<2x32xf32> to vector<2x32xbf16>
    %cst_54 = arith.constant dense<0.000000e+00> : vector<2x128xf32>
    %109 = tpu.matmul %108, %1, %cst_54 {dimension_numbers = #tpu.dot_dimension_numbers<[1], [0], [0], [1], [0, 0, 1, 1], [], []>} : vector<2x32xbf16>, vector<32x128xbf16>, vector<2x128xf32> -> vector<2x128xf32>
    %110 = arith.addf %80, %109 : vector<2x128xf32>
    %111 = arith.addf %110, %5 : vector<2x128xf32>
    %112 = math.tanh %111 : vector<2x128xf32>
    %113 = vector.extract_strided_slice %112 {offsets = [0, 0], sizes = [2, 32], strides = [1, 1]} : vector<2x128xf32> to vector<2x32xf32>
    %cst_55 = arith.constant 5.000000e-01 : f32
    %114 = vector.broadcast %cst_55 : f32 to vector<2x32xf32>
    %115 = arith.mulf %114, %113 : vector<2x32xf32>
    %cst_56 = arith.constant 5.000000e-01 : f32
    %116 = vector.broadcast %cst_56 : f32 to vector<2x32xf32>
    %117 = arith.addf %115, %116 : vector<2x32xf32>
    %118 = vector.extract_strided_slice %112 {offsets = [0, 32], sizes = [2, 32], strides = [1, 1]} : vector<2x128xf32> to vector<2x32xf32>
    %cst_57 = arith.constant 5.000000e-01 : f32
    %119 = vector.broadcast %cst_57 : f32 to vector<2x32xf32>
    %120 = arith.mulf %119, %118 : vector<2x32xf32>
    %cst_58 = arith.constant 5.000000e-01 : f32
    %121 = vector.broadcast %cst_58 : f32 to vector<2x32xf32>
    %122 = arith.addf %120, %121 : vector<2x32xf32>
    %123 = vector.extract_strided_slice %112 {offsets = [0, 64], sizes = [2, 32], strides = [1, 1]} : vector<2x128xf32> to vector<2x32xf32>
    %124 = vector.extract_strided_slice %112 {offsets = [0, 96], sizes = [2, 32], strides = [1, 1]} : vector<2x128xf32> to vector<2x32xf32>
    %cst_59 = arith.constant 5.000000e-01 : f32
    %125 = vector.broadcast %cst_59 : f32 to vector<2x32xf32>
    %126 = arith.mulf %125, %124 : vector<2x32xf32>
    %cst_60 = arith.constant 5.000000e-01 : f32
    %127 = vector.broadcast %cst_60 : f32 to vector<2x32xf32>
    %128 = arith.addf %126, %127 : vector<2x32xf32>
    %129 = arith.mulf %122, %76 : vector<2x32xf32>
    %130 = arith.mulf %117, %123 : vector<2x32xf32>
    %131 = arith.addf %129, %130 : vector<2x32xf32>
    %132 = math.tanh %131 : vector<2x32xf32>
    %133 = arith.mulf %128, %132 : vector<2x32xf32>
    %134 = arith.truncf %133 : vector<2x32xf32> to vector<2x32xbf16>
    %cst_61 = arith.constant dense<0.000000e+00> : vector<2x128xf32>
    %135 = tpu.matmul %134, %2, %cst_61 {dimension_numbers = #tpu.dot_dimension_numbers<[1], [0], [0], [1], [0, 0, 1, 1], [], []>} : vector<2x32xbf16>, vector<32x128xbf16>, vector<2x128xf32> -> vector<2x128xf32>
    %c0_62 = arith.constant 0 : index
    %c2 = arith.constant 2 : index
    %c0_63 = arith.constant 0 : index
    %136 = vector.load %arg9[%c0_62, %c2, %c0_63] : memref<2x8x128xf32, #tpu.memory_space<vmem>>, vector<2x1x128xf32>
    %137 = vector.shape_cast %136 : vector<2x1x128xf32> to vector<2x128xf32>
    %138 = arith.truncf %107 : vector<2x32xf32> to vector<2x32xbf16>
    %cst_64 = arith.constant dense<0.000000e+00> : vector<2x128xf32>
    %139 = tpu.matmul %138, %0, %cst_64 {dimension_numbers = #tpu.dot_dimension_numbers<[1], [0], [0], [1], [0, 0, 1, 1], [], []>} : vector<2x32xbf16>, vector<32x128xbf16>, vector<2x128xf32> -> vector<2x128xf32>
    %140 = arith.addf %137, %139 : vector<2x128xf32>
    %141 = math.tanh %140 : vector<2x128xf32>
    %142 = vector.extract_strided_slice %141 {offsets = [0, 0], sizes = [2, 32], strides = [1, 1]} : vector<2x128xf32> to vector<2x32xf32>
    %cst_65 = arith.constant 5.000000e-01 : f32
    %143 = vector.broadcast %cst_65 : f32 to vector<2x32xf32>
    %144 = arith.mulf %143, %142 : vector<2x32xf32>
    %cst_66 = arith.constant 5.000000e-01 : f32
    %145 = vector.broadcast %cst_66 : f32 to vector<2x32xf32>
    %146 = arith.addf %144, %145 : vector<2x32xf32>
    %147 = vector.extract_strided_slice %141 {offsets = [0, 32], sizes = [2, 32], strides = [1, 1]} : vector<2x128xf32> to vector<2x32xf32>
    %cst_67 = arith.constant 5.000000e-01 : f32
    %148 = vector.broadcast %cst_67 : f32 to vector<2x32xf32>
    %149 = arith.mulf %148, %147 : vector<2x32xf32>
    %cst_68 = arith.constant 5.000000e-01 : f32
    %150 = vector.broadcast %cst_68 : f32 to vector<2x32xf32>
    %151 = arith.addf %149, %150 : vector<2x32xf32>
    %152 = vector.extract_strided_slice %141 {offsets = [0, 64], sizes = [2, 32], strides = [1, 1]} : vector<2x128xf32> to vector<2x32xf32>
    %153 = vector.extract_strided_slice %141 {offsets = [0, 96], sizes = [2, 32], strides = [1, 1]} : vector<2x128xf32> to vector<2x32xf32>
    %cst_69 = arith.constant 5.000000e-01 : f32
    %154 = vector.broadcast %cst_69 : f32 to vector<2x32xf32>
    %155 = arith.mulf %154, %153 : vector<2x32xf32>
    %cst_70 = arith.constant 5.000000e-01 : f32
    %156 = vector.broadcast %cst_70 : f32 to vector<2x32xf32>
    %157 = arith.addf %155, %156 : vector<2x32xf32>
    %158 = arith.mulf %151, %105 : vector<2x32xf32>
    %159 = arith.mulf %146, %152 : vector<2x32xf32>
    %160 = arith.addf %158, %159 : vector<2x32xf32>
    %161 = math.tanh %160 : vector<2x32xf32>
    %162 = arith.mulf %157, %161 : vector<2x32xf32>
    %163 = arith.truncf %162 : vector<2x32xf32> to vector<2x32xbf16>
    %cst_71 = arith.constant dense<0.000000e+00> : vector<2x128xf32>
    %164 = tpu.matmul %163, %1, %cst_71 {dimension_numbers = #tpu.dot_dimension_numbers<[1], [0], [0], [1], [0, 0, 1, 1], [], []>} : vector<2x32xbf16>, vector<32x128xbf16>, vector<2x128xf32> -> vector<2x128xf32>
    %165 = arith.addf %135, %164 : vector<2x128xf32>
    %166 = arith.addf %165, %5 : vector<2x128xf32>
    %167 = math.tanh %166 : vector<2x128xf32>
    %168 = vector.extract_strided_slice %167 {offsets = [0, 0], sizes = [2, 32], strides = [1, 1]} : vector<2x128xf32> to vector<2x32xf32>
    %cst_72 = arith.constant 5.000000e-01 : f32
    %169 = vector.broadcast %cst_72 : f32 to vector<2x32xf32>
    %170 = arith.mulf %169, %168 : vector<2x32xf32>
    %cst_73 = arith.constant 5.000000e-01 : f32
    %171 = vector.broadcast %cst_73 : f32 to vector<2x32xf32>
    %172 = arith.addf %170, %171 : vector<2x32xf32>
    %173 = vector.extract_strided_slice %167 {offsets = [0, 32], sizes = [2, 32], strides = [1, 1]} : vector<2x128xf32> to vector<2x32xf32>
    %cst_74 = arith.constant 5.000000e-01 : f32
    %174 = vector.broadcast %cst_74 : f32 to vector<2x32xf32>
    %175 = arith.mulf %174, %173 : vector<2x32xf32>
    %cst_75 = arith.constant 5.000000e-01 : f32
    %176 = vector.broadcast %cst_75 : f32 to vector<2x32xf32>
    %177 = arith.addf %175, %176 : vector<2x32xf32>
    %178 = vector.extract_strided_slice %167 {offsets = [0, 64], sizes = [2, 32], strides = [1, 1]} : vector<2x128xf32> to vector<2x32xf32>
    %179 = vector.extract_strided_slice %167 {offsets = [0, 96], sizes = [2, 32], strides = [1, 1]} : vector<2x128xf32> to vector<2x32xf32>
    %cst_76 = arith.constant 5.000000e-01 : f32
    %180 = vector.broadcast %cst_76 : f32 to vector<2x32xf32>
    %181 = arith.mulf %180, %179 : vector<2x32xf32>
    %cst_77 = arith.constant 5.000000e-01 : f32
    %182 = vector.broadcast %cst_77 : f32 to vector<2x32xf32>
    %183 = arith.addf %181, %182 : vector<2x32xf32>
    %184 = arith.mulf %177, %131 : vector<2x32xf32>
    %185 = arith.mulf %172, %178 : vector<2x32xf32>
    %186 = arith.addf %184, %185 : vector<2x32xf32>
    %187 = math.tanh %186 : vector<2x32xf32>
    %188 = arith.mulf %183, %187 : vector<2x32xf32>
    %189 = arith.truncf %188 : vector<2x32xf32> to vector<2x32xbf16>
    %cst_78 = arith.constant dense<0.000000e+00> : vector<2x128xf32>
    %190 = tpu.matmul %189, %2, %cst_78 {dimension_numbers = #tpu.dot_dimension_numbers<[1], [0], [0], [1], [0, 0, 1, 1], [], []>} : vector<2x32xbf16>, vector<32x128xbf16>, vector<2x128xf32> -> vector<2x128xf32>
    %c0_79 = arith.constant 0 : index
    %c3 = arith.constant 3 : index
    %c0_80 = arith.constant 0 : index
    %191 = vector.load %arg9[%c0_79, %c3, %c0_80] : memref<2x8x128xf32, #tpu.memory_space<vmem>>, vector<2x1x128xf32>
    %192 = vector.shape_cast %191 : vector<2x1x128xf32> to vector<2x128xf32>
    %193 = arith.truncf %162 : vector<2x32xf32> to vector<2x32xbf16>
    %cst_81 = arith.constant dense<0.000000e+00> : vector<2x128xf32>
    %194 = tpu.matmul %193, %0, %cst_81 {dimension_numbers = #tpu.dot_dimension_numbers<[1], [0], [0], [1], [0, 0, 1, 1], [], []>} : vector<2x32xbf16>, vector<32x128xbf16>, vector<2x128xf32> -> vector<2x128xf32>
    %195 = arith.addf %192, %194 : vector<2x128xf32>
    %196 = math.tanh %195 : vector<2x128xf32>
    %197 = vector.extract_strided_slice %196 {offsets = [0, 0], sizes = [2, 32], strides = [1, 1]} : vector<2x128xf32> to vector<2x32xf32>
    %cst_82 = arith.constant 5.000000e-01 : f32
    %198 = vector.broadcast %cst_82 : f32 to vector<2x32xf32>
    %199 = arith.mulf %198, %197 : vector<2x32xf32>
    %cst_83 = arith.constant 5.000000e-01 : f32
    %200 = vector.broadcast %cst_83 : f32 to vector<2x32xf32>
    %201 = arith.addf %199, %200 : vector<2x32xf32>
    %202 = vector.extract_strided_slice %196 {offsets = [0, 32], sizes = [2, 32], strides = [1, 1]} : vector<2x128xf32> to vector<2x32xf32>
    %cst_84 = arith.constant 5.000000e-01 : f32
    %203 = vector.broadcast %cst_84 : f32 to vector<2x32xf32>
    %204 = arith.mulf %203, %202 : vector<2x32xf32>
    %cst_85 = arith.constant 5.000000e-01 : f32
    %205 = vector.broadcast %cst_85 : f32 to vector<2x32xf32>
    %206 = arith.addf %204, %205 : vector<2x32xf32>
    %207 = vector.extract_strided_slice %196 {offsets = [0, 64], sizes = [2, 32], strides = [1, 1]} : vector<2x128xf32> to vector<2x32xf32>
    %208 = vector.extract_strided_slice %196 {offsets = [0, 96], sizes = [2, 32], strides = [1, 1]} : vector<2x128xf32> to vector<2x32xf32>
    %cst_86 = arith.constant 5.000000e-01 : f32
    %209 = vector.broadcast %cst_86 : f32 to vector<2x32xf32>
    %210 = arith.mulf %209, %208 : vector<2x32xf32>
    %cst_87 = arith.constant 5.000000e-01 : f32
    %211 = vector.broadcast %cst_87 : f32 to vector<2x32xf32>
    %212 = arith.addf %210, %211 : vector<2x32xf32>
    %213 = arith.mulf %206, %160 : vector<2x32xf32>
    %214 = arith.mulf %201, %207 : vector<2x32xf32>
    %215 = arith.addf %213, %214 : vector<2x32xf32>
    %216 = math.tanh %215 : vector<2x32xf32>
    %217 = arith.mulf %212, %216 : vector<2x32xf32>
    %218 = arith.truncf %217 : vector<2x32xf32> to vector<2x32xbf16>
    %cst_88 = arith.constant dense<0.000000e+00> : vector<2x128xf32>
    %219 = tpu.matmul %218, %1, %cst_88 {dimension_numbers = #tpu.dot_dimension_numbers<[1], [0], [0], [1], [0, 0, 1, 1], [], []>} : vector<2x32xbf16>, vector<32x128xbf16>, vector<2x128xf32> -> vector<2x128xf32>
    %220 = arith.addf %190, %219 : vector<2x128xf32>
    %221 = arith.addf %220, %5 : vector<2x128xf32>
    %222 = math.tanh %221 : vector<2x128xf32>
    %223 = vector.extract_strided_slice %222 {offsets = [0, 0], sizes = [2, 32], strides = [1, 1]} : vector<2x128xf32> to vector<2x32xf32>
    %cst_89 = arith.constant 5.000000e-01 : f32
    %224 = vector.broadcast %cst_89 : f32 to vector<2x32xf32>
    %225 = arith.mulf %224, %223 : vector<2x32xf32>
    %cst_90 = arith.constant 5.000000e-01 : f32
    %226 = vector.broadcast %cst_90 : f32 to vector<2x32xf32>
    %227 = arith.addf %225, %226 : vector<2x32xf32>
    %228 = vector.extract_strided_slice %222 {offsets = [0, 32], sizes = [2, 32], strides = [1, 1]} : vector<2x128xf32> to vector<2x32xf32>
    %cst_91 = arith.constant 5.000000e-01 : f32
    %229 = vector.broadcast %cst_91 : f32 to vector<2x32xf32>
    %230 = arith.mulf %229, %228 : vector<2x32xf32>
    %cst_92 = arith.constant 5.000000e-01 : f32
    %231 = vector.broadcast %cst_92 : f32 to vector<2x32xf32>
    %232 = arith.addf %230, %231 : vector<2x32xf32>
    %233 = vector.extract_strided_slice %222 {offsets = [0, 64], sizes = [2, 32], strides = [1, 1]} : vector<2x128xf32> to vector<2x32xf32>
    %234 = vector.extract_strided_slice %222 {offsets = [0, 96], sizes = [2, 32], strides = [1, 1]} : vector<2x128xf32> to vector<2x32xf32>
    %cst_93 = arith.constant 5.000000e-01 : f32
    %235 = vector.broadcast %cst_93 : f32 to vector<2x32xf32>
    %236 = arith.mulf %235, %234 : vector<2x32xf32>
    %cst_94 = arith.constant 5.000000e-01 : f32
    %237 = vector.broadcast %cst_94 : f32 to vector<2x32xf32>
    %238 = arith.addf %236, %237 : vector<2x32xf32>
    %239 = arith.mulf %232, %186 : vector<2x32xf32>
    %240 = arith.mulf %227, %233 : vector<2x32xf32>
    %241 = arith.addf %239, %240 : vector<2x32xf32>
    %242 = math.tanh %241 : vector<2x32xf32>
    %243 = arith.mulf %238, %242 : vector<2x32xf32>
    %244 = arith.truncf %243 : vector<2x32xf32> to vector<2x32xbf16>
    %cst_95 = arith.constant dense<0.000000e+00> : vector<2x128xf32>
    %245 = tpu.matmul %244, %2, %cst_95 {dimension_numbers = #tpu.dot_dimension_numbers<[1], [0], [0], [1], [0, 0, 1, 1], [], []>} : vector<2x32xbf16>, vector<32x128xbf16>, vector<2x128xf32> -> vector<2x128xf32>
    %c0_96 = arith.constant 0 : index
    %c4 = arith.constant 4 : index
    %c0_97 = arith.constant 0 : index
    %246 = vector.load %arg9[%c0_96, %c4, %c0_97] : memref<2x8x128xf32, #tpu.memory_space<vmem>>, vector<2x1x128xf32>
    %247 = vector.shape_cast %246 : vector<2x1x128xf32> to vector<2x128xf32>
    %248 = arith.truncf %217 : vector<2x32xf32> to vector<2x32xbf16>
    %cst_98 = arith.constant dense<0.000000e+00> : vector<2x128xf32>
    %249 = tpu.matmul %248, %0, %cst_98 {dimension_numbers = #tpu.dot_dimension_numbers<[1], [0], [0], [1], [0, 0, 1, 1], [], []>} : vector<2x32xbf16>, vector<32x128xbf16>, vector<2x128xf32> -> vector<2x128xf32>
    %250 = arith.addf %247, %249 : vector<2x128xf32>
    %251 = math.tanh %250 : vector<2x128xf32>
    %252 = vector.extract_strided_slice %251 {offsets = [0, 0], sizes = [2, 32], strides = [1, 1]} : vector<2x128xf32> to vector<2x32xf32>
    %cst_99 = arith.constant 5.000000e-01 : f32
    %253 = vector.broadcast %cst_99 : f32 to vector<2x32xf32>
    %254 = arith.mulf %253, %252 : vector<2x32xf32>
    %cst_100 = arith.constant 5.000000e-01 : f32
    %255 = vector.broadcast %cst_100 : f32 to vector<2x32xf32>
    %256 = arith.addf %254, %255 : vector<2x32xf32>
    %257 = vector.extract_strided_slice %251 {offsets = [0, 32], sizes = [2, 32], strides = [1, 1]} : vector<2x128xf32> to vector<2x32xf32>
    %cst_101 = arith.constant 5.000000e-01 : f32
    %258 = vector.broadcast %cst_101 : f32 to vector<2x32xf32>
    %259 = arith.mulf %258, %257 : vector<2x32xf32>
    %cst_102 = arith.constant 5.000000e-01 : f32
    %260 = vector.broadcast %cst_102 : f32 to vector<2x32xf32>
    %261 = arith.addf %259, %260 : vector<2x32xf32>
    %262 = vector.extract_strided_slice %251 {offsets = [0, 64], sizes = [2, 32], strides = [1, 1]} : vector<2x128xf32> to vector<2x32xf32>
    %263 = vector.extract_strided_slice %251 {offsets = [0, 96], sizes = [2, 32], strides = [1, 1]} : vector<2x128xf32> to vector<2x32xf32>
    %cst_103 = arith.constant 5.000000e-01 : f32
    %264 = vector.broadcast %cst_103 : f32 to vector<2x32xf32>
    %265 = arith.mulf %264, %263 : vector<2x32xf32>
    %cst_104 = arith.constant 5.000000e-01 : f32
    %266 = vector.broadcast %cst_104 : f32 to vector<2x32xf32>
    %267 = arith.addf %265, %266 : vector<2x32xf32>
    %268 = arith.mulf %261, %215 : vector<2x32xf32>
    %269 = arith.mulf %256, %262 : vector<2x32xf32>
    %270 = arith.addf %268, %269 : vector<2x32xf32>
    %271 = math.tanh %270 : vector<2x32xf32>
    %272 = arith.mulf %267, %271 : vector<2x32xf32>
    %273 = arith.truncf %272 : vector<2x32xf32> to vector<2x32xbf16>
    %cst_105 = arith.constant dense<0.000000e+00> : vector<2x128xf32>
    %274 = tpu.matmul %273, %1, %cst_105 {dimension_numbers = #tpu.dot_dimension_numbers<[1], [0], [0], [1], [0, 0, 1, 1], [], []>} : vector<2x32xbf16>, vector<32x128xbf16>, vector<2x128xf32> -> vector<2x128xf32>
    %275 = arith.addf %245, %274 : vector<2x128xf32>
    %276 = arith.addf %275, %5 : vector<2x128xf32>
    %277 = math.tanh %276 : vector<2x128xf32>
    %278 = vector.extract_strided_slice %277 {offsets = [0, 0], sizes = [2, 32], strides = [1, 1]} : vector<2x128xf32> to vector<2x32xf32>
    %cst_106 = arith.constant 5.000000e-01 : f32
    %279 = vector.broadcast %cst_106 : f32 to vector<2x32xf32>
    %280 = arith.mulf %279, %278 : vector<2x32xf32>
    %cst_107 = arith.constant 5.000000e-01 : f32
    %281 = vector.broadcast %cst_107 : f32 to vector<2x32xf32>
    %282 = arith.addf %280, %281 : vector<2x32xf32>
    %283 = vector.extract_strided_slice %277 {offsets = [0, 32], sizes = [2, 32], strides = [1, 1]} : vector<2x128xf32> to vector<2x32xf32>
    %cst_108 = arith.constant 5.000000e-01 : f32
    %284 = vector.broadcast %cst_108 : f32 to vector<2x32xf32>
    %285 = arith.mulf %284, %283 : vector<2x32xf32>
    %cst_109 = arith.constant 5.000000e-01 : f32
    %286 = vector.broadcast %cst_109 : f32 to vector<2x32xf32>
    %287 = arith.addf %285, %286 : vector<2x32xf32>
    %288 = vector.extract_strided_slice %277 {offsets = [0, 64], sizes = [2, 32], strides = [1, 1]} : vector<2x128xf32> to vector<2x32xf32>
    %289 = vector.extract_strided_slice %277 {offsets = [0, 96], sizes = [2, 32], strides = [1, 1]} : vector<2x128xf32> to vector<2x32xf32>
    %cst_110 = arith.constant 5.000000e-01 : f32
    %290 = vector.broadcast %cst_110 : f32 to vector<2x32xf32>
    %291 = arith.mulf %290, %289 : vector<2x32xf32>
    %cst_111 = arith.constant 5.000000e-01 : f32
    %292 = vector.broadcast %cst_111 : f32 to vector<2x32xf32>
    %293 = arith.addf %291, %292 : vector<2x32xf32>
    %294 = arith.mulf %287, %241 : vector<2x32xf32>
    %295 = arith.mulf %282, %288 : vector<2x32xf32>
    %296 = arith.addf %294, %295 : vector<2x32xf32>
    %297 = math.tanh %296 : vector<2x32xf32>
    %298 = arith.mulf %293, %297 : vector<2x32xf32>
    %299 = arith.truncf %298 : vector<2x32xf32> to vector<2x32xbf16>
    %cst_112 = arith.constant dense<0.000000e+00> : vector<2x128xf32>
    %300 = tpu.matmul %299, %2, %cst_112 {dimension_numbers = #tpu.dot_dimension_numbers<[1], [0], [0], [1], [0, 0, 1, 1], [], []>} : vector<2x32xbf16>, vector<32x128xbf16>, vector<2x128xf32> -> vector<2x128xf32>
    %c0_113 = arith.constant 0 : index
    %c5 = arith.constant 5 : index
    %c0_114 = arith.constant 0 : index
    %301 = vector.load %arg9[%c0_113, %c5, %c0_114] : memref<2x8x128xf32, #tpu.memory_space<vmem>>, vector<2x1x128xf32>
    %302 = vector.shape_cast %301 : vector<2x1x128xf32> to vector<2x128xf32>
    %303 = arith.truncf %272 : vector<2x32xf32> to vector<2x32xbf16>
    %cst_115 = arith.constant dense<0.000000e+00> : vector<2x128xf32>
    %304 = tpu.matmul %303, %0, %cst_115 {dimension_numbers = #tpu.dot_dimension_numbers<[1], [0], [0], [1], [0, 0, 1, 1], [], []>} : vector<2x32xbf16>, vector<32x128xbf16>, vector<2x128xf32> -> vector<2x128xf32>
    %305 = arith.addf %302, %304 : vector<2x128xf32>
    %306 = math.tanh %305 : vector<2x128xf32>
    %307 = vector.extract_strided_slice %306 {offsets = [0, 0], sizes = [2, 32], strides = [1, 1]} : vector<2x128xf32> to vector<2x32xf32>
    %cst_116 = arith.constant 5.000000e-01 : f32
    %308 = vector.broadcast %cst_116 : f32 to vector<2x32xf32>
    %309 = arith.mulf %308, %307 : vector<2x32xf32>
    %cst_117 = arith.constant 5.000000e-01 : f32
    %310 = vector.broadcast %cst_117 : f32 to vector<2x32xf32>
    %311 = arith.addf %309, %310 : vector<2x32xf32>
    %312 = vector.extract_strided_slice %306 {offsets = [0, 32], sizes = [2, 32], strides = [1, 1]} : vector<2x128xf32> to vector<2x32xf32>
    %cst_118 = arith.constant 5.000000e-01 : f32
    %313 = vector.broadcast %cst_118 : f32 to vector<2x32xf32>
    %314 = arith.mulf %313, %312 : vector<2x32xf32>
    %cst_119 = arith.constant 5.000000e-01 : f32
    %315 = vector.broadcast %cst_119 : f32 to vector<2x32xf32>
    %316 = arith.addf %314, %315 : vector<2x32xf32>
    %317 = vector.extract_strided_slice %306 {offsets = [0, 64], sizes = [2, 32], strides = [1, 1]} : vector<2x128xf32> to vector<2x32xf32>
    %318 = vector.extract_strided_slice %306 {offsets = [0, 96], sizes = [2, 32], strides = [1, 1]} : vector<2x128xf32> to vector<2x32xf32>
    %cst_120 = arith.constant 5.000000e-01 : f32
    %319 = vector.broadcast %cst_120 : f32 to vector<2x32xf32>
    %320 = arith.mulf %319, %318 : vector<2x32xf32>
    %cst_121 = arith.constant 5.000000e-01 : f32
    %321 = vector.broadcast %cst_121 : f32 to vector<2x32xf32>
    %322 = arith.addf %320, %321 : vector<2x32xf32>
    %323 = arith.mulf %316, %270 : vector<2x32xf32>
    %324 = arith.mulf %311, %317 : vector<2x32xf32>
    %325 = arith.addf %323, %324 : vector<2x32xf32>
    %326 = math.tanh %325 : vector<2x32xf32>
    %327 = arith.mulf %322, %326 : vector<2x32xf32>
    %328 = arith.truncf %327 : vector<2x32xf32> to vector<2x32xbf16>
    %cst_122 = arith.constant dense<0.000000e+00> : vector<2x128xf32>
    %329 = tpu.matmul %328, %1, %cst_122 {dimension_numbers = #tpu.dot_dimension_numbers<[1], [0], [0], [1], [0, 0, 1, 1], [], []>} : vector<2x32xbf16>, vector<32x128xbf16>, vector<2x128xf32> -> vector<2x128xf32>
    %330 = arith.addf %300, %329 : vector<2x128xf32>
    %331 = arith.addf %330, %5 : vector<2x128xf32>
    %332 = math.tanh %331 : vector<2x128xf32>
    %333 = vector.extract_strided_slice %332 {offsets = [0, 0], sizes = [2, 32], strides = [1, 1]} : vector<2x128xf32> to vector<2x32xf32>
    %cst_123 = arith.constant 5.000000e-01 : f32
    %334 = vector.broadcast %cst_123 : f32 to vector<2x32xf32>
    %335 = arith.mulf %334, %333 : vector<2x32xf32>
    %cst_124 = arith.constant 5.000000e-01 : f32
    %336 = vector.broadcast %cst_124 : f32 to vector<2x32xf32>
    %337 = arith.addf %335, %336 : vector<2x32xf32>
    %338 = vector.extract_strided_slice %332 {offsets = [0, 32], sizes = [2, 32], strides = [1, 1]} : vector<2x128xf32> to vector<2x32xf32>
    %cst_125 = arith.constant 5.000000e-01 : f32
    %339 = vector.broadcast %cst_125 : f32 to vector<2x32xf32>
    %340 = arith.mulf %339, %338 : vector<2x32xf32>
    %cst_126 = arith.constant 5.000000e-01 : f32
    %341 = vector.broadcast %cst_126 : f32 to vector<2x32xf32>
    %342 = arith.addf %340, %341 : vector<2x32xf32>
    %343 = vector.extract_strided_slice %332 {offsets = [0, 64], sizes = [2, 32], strides = [1, 1]} : vector<2x128xf32> to vector<2x32xf32>
    %344 = vector.extract_strided_slice %332 {offsets = [0, 96], sizes = [2, 32], strides = [1, 1]} : vector<2x128xf32> to vector<2x32xf32>
    %cst_127 = arith.constant 5.000000e-01 : f32
    %345 = vector.broadcast %cst_127 : f32 to vector<2x32xf32>
    %346 = arith.mulf %345, %344 : vector<2x32xf32>
    %cst_128 = arith.constant 5.000000e-01 : f32
    %347 = vector.broadcast %cst_128 : f32 to vector<2x32xf32>
    %348 = arith.addf %346, %347 : vector<2x32xf32>
    %349 = arith.mulf %342, %296 : vector<2x32xf32>
    %350 = arith.mulf %337, %343 : vector<2x32xf32>
    %351 = arith.addf %349, %350 : vector<2x32xf32>
    %352 = math.tanh %351 : vector<2x32xf32>
    %353 = arith.mulf %348, %352 : vector<2x32xf32>
    %354 = arith.truncf %353 : vector<2x32xf32> to vector<2x32xbf16>
    %cst_129 = arith.constant dense<0.000000e+00> : vector<2x128xf32>
    %355 = tpu.matmul %354, %2, %cst_129 {dimension_numbers = #tpu.dot_dimension_numbers<[1], [0], [0], [1], [0, 0, 1, 1], [], []>} : vector<2x32xbf16>, vector<32x128xbf16>, vector<2x128xf32> -> vector<2x128xf32>
    %c0_130 = arith.constant 0 : index
    %c6 = arith.constant 6 : index
    %c0_131 = arith.constant 0 : index
    %356 = vector.load %arg9[%c0_130, %c6, %c0_131] : memref<2x8x128xf32, #tpu.memory_space<vmem>>, vector<2x1x128xf32>
    %357 = vector.shape_cast %356 : vector<2x1x128xf32> to vector<2x128xf32>
    %358 = arith.truncf %327 : vector<2x32xf32> to vector<2x32xbf16>
    %cst_132 = arith.constant dense<0.000000e+00> : vector<2x128xf32>
    %359 = tpu.matmul %358, %0, %cst_132 {dimension_numbers = #tpu.dot_dimension_numbers<[1], [0], [0], [1], [0, 0, 1, 1], [], []>} : vector<2x32xbf16>, vector<32x128xbf16>, vector<2x128xf32> -> vector<2x128xf32>
    %360 = arith.addf %357, %359 : vector<2x128xf32>
    %361 = math.tanh %360 : vector<2x128xf32>
    %362 = vector.extract_strided_slice %361 {offsets = [0, 0], sizes = [2, 32], strides = [1, 1]} : vector<2x128xf32> to vector<2x32xf32>
    %cst_133 = arith.constant 5.000000e-01 : f32
    %363 = vector.broadcast %cst_133 : f32 to vector<2x32xf32>
    %364 = arith.mulf %363, %362 : vector<2x32xf32>
    %cst_134 = arith.constant 5.000000e-01 : f32
    %365 = vector.broadcast %cst_134 : f32 to vector<2x32xf32>
    %366 = arith.addf %364, %365 : vector<2x32xf32>
    %367 = vector.extract_strided_slice %361 {offsets = [0, 32], sizes = [2, 32], strides = [1, 1]} : vector<2x128xf32> to vector<2x32xf32>
    %cst_135 = arith.constant 5.000000e-01 : f32
    %368 = vector.broadcast %cst_135 : f32 to vector<2x32xf32>
    %369 = arith.mulf %368, %367 : vector<2x32xf32>
    %cst_136 = arith.constant 5.000000e-01 : f32
    %370 = vector.broadcast %cst_136 : f32 to vector<2x32xf32>
    %371 = arith.addf %369, %370 : vector<2x32xf32>
    %372 = vector.extract_strided_slice %361 {offsets = [0, 64], sizes = [2, 32], strides = [1, 1]} : vector<2x128xf32> to vector<2x32xf32>
    %373 = vector.extract_strided_slice %361 {offsets = [0, 96], sizes = [2, 32], strides = [1, 1]} : vector<2x128xf32> to vector<2x32xf32>
    %cst_137 = arith.constant 5.000000e-01 : f32
    %374 = vector.broadcast %cst_137 : f32 to vector<2x32xf32>
    %375 = arith.mulf %374, %373 : vector<2x32xf32>
    %cst_138 = arith.constant 5.000000e-01 : f32
    %376 = vector.broadcast %cst_138 : f32 to vector<2x32xf32>
    %377 = arith.addf %375, %376 : vector<2x32xf32>
    %378 = arith.mulf %371, %325 : vector<2x32xf32>
    %379 = arith.mulf %366, %372 : vector<2x32xf32>
    %380 = arith.addf %378, %379 : vector<2x32xf32>
    %381 = math.tanh %380 : vector<2x32xf32>
    %382 = arith.mulf %377, %381 : vector<2x32xf32>
    %383 = arith.truncf %382 : vector<2x32xf32> to vector<2x32xbf16>
    %cst_139 = arith.constant dense<0.000000e+00> : vector<2x128xf32>
    %384 = tpu.matmul %383, %1, %cst_139 {dimension_numbers = #tpu.dot_dimension_numbers<[1], [0], [0], [1], [0, 0, 1, 1], [], []>} : vector<2x32xbf16>, vector<32x128xbf16>, vector<2x128xf32> -> vector<2x128xf32>
    %385 = arith.addf %355, %384 : vector<2x128xf32>
    %386 = arith.addf %385, %5 : vector<2x128xf32>
    %387 = math.tanh %386 : vector<2x128xf32>
    %388 = vector.extract_strided_slice %387 {offsets = [0, 0], sizes = [2, 32], strides = [1, 1]} : vector<2x128xf32> to vector<2x32xf32>
    %cst_140 = arith.constant 5.000000e-01 : f32
    %389 = vector.broadcast %cst_140 : f32 to vector<2x32xf32>
    %390 = arith.mulf %389, %388 : vector<2x32xf32>
    %cst_141 = arith.constant 5.000000e-01 : f32
    %391 = vector.broadcast %cst_141 : f32 to vector<2x32xf32>
    %392 = arith.addf %390, %391 : vector<2x32xf32>
    %393 = vector.extract_strided_slice %387 {offsets = [0, 32], sizes = [2, 32], strides = [1, 1]} : vector<2x128xf32> to vector<2x32xf32>
    %cst_142 = arith.constant 5.000000e-01 : f32
    %394 = vector.broadcast %cst_142 : f32 to vector<2x32xf32>
    %395 = arith.mulf %394, %393 : vector<2x32xf32>
    %cst_143 = arith.constant 5.000000e-01 : f32
    %396 = vector.broadcast %cst_143 : f32 to vector<2x32xf32>
    %397 = arith.addf %395, %396 : vector<2x32xf32>
    %398 = vector.extract_strided_slice %387 {offsets = [0, 64], sizes = [2, 32], strides = [1, 1]} : vector<2x128xf32> to vector<2x32xf32>
    %399 = vector.extract_strided_slice %387 {offsets = [0, 96], sizes = [2, 32], strides = [1, 1]} : vector<2x128xf32> to vector<2x32xf32>
    %cst_144 = arith.constant 5.000000e-01 : f32
    %400 = vector.broadcast %cst_144 : f32 to vector<2x32xf32>
    %401 = arith.mulf %400, %399 : vector<2x32xf32>
    %cst_145 = arith.constant 5.000000e-01 : f32
    %402 = vector.broadcast %cst_145 : f32 to vector<2x32xf32>
    %403 = arith.addf %401, %402 : vector<2x32xf32>
    %404 = arith.mulf %397, %351 : vector<2x32xf32>
    %405 = arith.mulf %392, %398 : vector<2x32xf32>
    %406 = arith.addf %404, %405 : vector<2x32xf32>
    %407 = math.tanh %406 : vector<2x32xf32>
    %408 = arith.mulf %403, %407 : vector<2x32xf32>
    %409 = arith.truncf %408 : vector<2x32xf32> to vector<2x32xbf16>
    %cst_146 = arith.constant dense<0.000000e+00> : vector<2x128xf32>
    %410 = tpu.matmul %409, %2, %cst_146 {dimension_numbers = #tpu.dot_dimension_numbers<[1], [0], [0], [1], [0, 0, 1, 1], [], []>} : vector<2x32xbf16>, vector<32x128xbf16>, vector<2x128xf32> -> vector<2x128xf32>
    %c0_147 = arith.constant 0 : index
    %c7 = arith.constant 7 : index
    %c0_148 = arith.constant 0 : index
    %411 = vector.load %arg9[%c0_147, %c7, %c0_148] : memref<2x8x128xf32, #tpu.memory_space<vmem>>, vector<2x1x128xf32>
    %412 = vector.shape_cast %411 : vector<2x1x128xf32> to vector<2x128xf32>
    %413 = arith.truncf %382 : vector<2x32xf32> to vector<2x32xbf16>
    %cst_149 = arith.constant dense<0.000000e+00> : vector<2x128xf32>
    %414 = tpu.matmul %413, %0, %cst_149 {dimension_numbers = #tpu.dot_dimension_numbers<[1], [0], [0], [1], [0, 0, 1, 1], [], []>} : vector<2x32xbf16>, vector<32x128xbf16>, vector<2x128xf32> -> vector<2x128xf32>
    %415 = arith.addf %412, %414 : vector<2x128xf32>
    %416 = math.tanh %415 : vector<2x128xf32>
    %417 = vector.extract_strided_slice %416 {offsets = [0, 0], sizes = [2, 32], strides = [1, 1]} : vector<2x128xf32> to vector<2x32xf32>
    %cst_150 = arith.constant 5.000000e-01 : f32
    %418 = vector.broadcast %cst_150 : f32 to vector<2x32xf32>
    %419 = arith.mulf %418, %417 : vector<2x32xf32>
    %cst_151 = arith.constant 5.000000e-01 : f32
    %420 = vector.broadcast %cst_151 : f32 to vector<2x32xf32>
    %421 = arith.addf %419, %420 : vector<2x32xf32>
    %422 = vector.extract_strided_slice %416 {offsets = [0, 32], sizes = [2, 32], strides = [1, 1]} : vector<2x128xf32> to vector<2x32xf32>
    %cst_152 = arith.constant 5.000000e-01 : f32
    %423 = vector.broadcast %cst_152 : f32 to vector<2x32xf32>
    %424 = arith.mulf %423, %422 : vector<2x32xf32>
    %cst_153 = arith.constant 5.000000e-01 : f32
    %425 = vector.broadcast %cst_153 : f32 to vector<2x32xf32>
    %426 = arith.addf %424, %425 : vector<2x32xf32>
    %427 = vector.extract_strided_slice %416 {offsets = [0, 64], sizes = [2, 32], strides = [1, 1]} : vector<2x128xf32> to vector<2x32xf32>
    %428 = vector.extract_strided_slice %416 {offsets = [0, 96], sizes = [2, 32], strides = [1, 1]} : vector<2x128xf32> to vector<2x32xf32>
    %cst_154 = arith.constant 5.000000e-01 : f32
    %429 = vector.broadcast %cst_154 : f32 to vector<2x32xf32>
    %430 = arith.mulf %429, %428 : vector<2x32xf32>
    %cst_155 = arith.constant 5.000000e-01 : f32
    %431 = vector.broadcast %cst_155 : f32 to vector<2x32xf32>
    %432 = arith.addf %430, %431 : vector<2x32xf32>
    %433 = arith.mulf %426, %380 : vector<2x32xf32>
    %434 = arith.mulf %421, %427 : vector<2x32xf32>
    %435 = arith.addf %433, %434 : vector<2x32xf32>
    %436 = math.tanh %435 : vector<2x32xf32>
    %437 = arith.mulf %432, %436 : vector<2x32xf32>
    %438 = arith.truncf %437 : vector<2x32xf32> to vector<2x32xbf16>
    %cst_156 = arith.constant dense<0.000000e+00> : vector<2x128xf32>
    %439 = tpu.matmul %438, %1, %cst_156 {dimension_numbers = #tpu.dot_dimension_numbers<[1], [0], [0], [1], [0, 0, 1, 1], [], []>} : vector<2x32xbf16>, vector<32x128xbf16>, vector<2x128xf32> -> vector<2x128xf32>
    %440 = arith.addf %410, %439 : vector<2x128xf32>
    %441 = arith.addf %440, %5 : vector<2x128xf32>
    %442 = math.tanh %441 : vector<2x128xf32>
    %443 = vector.extract_strided_slice %442 {offsets = [0, 0], sizes = [2, 32], strides = [1, 1]} : vector<2x128xf32> to vector<2x32xf32>
    %cst_157 = arith.constant 5.000000e-01 : f32
    %444 = vector.broadcast %cst_157 : f32 to vector<2x32xf32>
    %445 = arith.mulf %444, %443 : vector<2x32xf32>
    %cst_158 = arith.constant 5.000000e-01 : f32
    %446 = vector.broadcast %cst_158 : f32 to vector<2x32xf32>
    %447 = arith.addf %445, %446 : vector<2x32xf32>
    %448 = vector.extract_strided_slice %442 {offsets = [0, 32], sizes = [2, 32], strides = [1, 1]} : vector<2x128xf32> to vector<2x32xf32>
    %cst_159 = arith.constant 5.000000e-01 : f32
    %449 = vector.broadcast %cst_159 : f32 to vector<2x32xf32>
    %450 = arith.mulf %449, %448 : vector<2x32xf32>
    %cst_160 = arith.constant 5.000000e-01 : f32
    %451 = vector.broadcast %cst_160 : f32 to vector<2x32xf32>
    %452 = arith.addf %450, %451 : vector<2x32xf32>
    %453 = vector.extract_strided_slice %442 {offsets = [0, 64], sizes = [2, 32], strides = [1, 1]} : vector<2x128xf32> to vector<2x32xf32>
    %454 = vector.extract_strided_slice %442 {offsets = [0, 96], sizes = [2, 32], strides = [1, 1]} : vector<2x128xf32> to vector<2x32xf32>
    %cst_161 = arith.constant 5.000000e-01 : f32
    %455 = vector.broadcast %cst_161 : f32 to vector<2x32xf32>
    %456 = arith.mulf %455, %454 : vector<2x32xf32>
    %cst_162 = arith.constant 5.000000e-01 : f32
    %457 = vector.broadcast %cst_162 : f32 to vector<2x32xf32>
    %458 = arith.addf %456, %457 : vector<2x32xf32>
    %459 = arith.mulf %452, %406 : vector<2x32xf32>
    %460 = arith.mulf %447, %453 : vector<2x32xf32>
    %461 = arith.addf %459, %460 : vector<2x32xf32>
    %462 = math.tanh %461 : vector<2x32xf32>
    %463 = arith.mulf %458, %462 : vector<2x32xf32>
    %c0_163 = arith.constant 0 : index
    %c0_164 = arith.constant 0 : index
    %c0_165 = arith.constant 0 : index
    %464 = vector.load %arg7[%c0_163, %c0_164, %c0_165] : memref<2x2x32xf32, #tpu.memory_space<vmem>>, vector<1x2x32xf32>
    %465 = vector.shape_cast %464 : vector<1x2x32xf32> to vector<2x32xf32>
    %466 = vector.shape_cast %437 : vector<2x32xf32> to vector<1x2x32xf32>
    tpu.vector_store %arg7[%c0_163, %c0_164, %c0_165], %466 {strides = array<i32>} : memref<2x2x32xf32, #tpu.memory_space<vmem>>, vector<1x2x32xf32>,
    %c1_166 = arith.constant 1 : index
    %c0_167 = arith.constant 0 : index
    %c0_168 = arith.constant 0 : index
    %467 = vector.load %arg7[%c1_166, %c0_167, %c0_168] : memref<2x2x32xf32, #tpu.memory_space<vmem>>, vector<1x2x32xf32>
    %468 = vector.shape_cast %467 : vector<1x2x32xf32> to vector<2x32xf32>
    %469 = vector.shape_cast %463 : vector<2x32xf32> to vector<1x2x32xf32>
    tpu.vector_store %arg7[%c1_166, %c0_167, %c0_168], %469 {strides = array<i32>} : memref<2x2x32xf32, #tpu.memory_space<vmem>>, vector<1x2x32xf32>,
    %c0_169 = arith.constant 0 : index
    %c0_170 = arith.constant 0 : index
    %c0_171 = arith.constant 0 : index
    %470 = vector.load %arg8[%c0_169, %c0_170, %c0_171] : memref<2x2x32xf32, #tpu.memory_space<vmem>>, vector<1x2x32xf32>
    %471 = vector.shape_cast %470 : vector<1x2x32xf32> to vector<2x32xf32>
    %472 = vector.shape_cast %435 : vector<2x32xf32> to vector<1x2x32xf32>
    tpu.vector_store %arg8[%c0_169, %c0_170, %c0_171], %472 {strides = array<i32>} : memref<2x2x32xf32, #tpu.memory_space<vmem>>, vector<1x2x32xf32>,
    %c1_172 = arith.constant 1 : index
    %c0_173 = arith.constant 0 : index
    %c0_174 = arith.constant 0 : index
    %473 = vector.load %arg8[%c1_172, %c0_173, %c0_174] : memref<2x2x32xf32, #tpu.memory_space<vmem>>, vector<1x2x32xf32>
    %474 = vector.shape_cast %473 : vector<1x2x32xf32> to vector<2x32xf32>
    %475 = vector.shape_cast %461 : vector<2x32xf32> to vector<1x2x32xf32>
    tpu.vector_store %arg8[%c1_172, %c0_173, %c0_174], %475 {strides = array<i32>} : memref<2x2x32xf32, #tpu.memory_space<vmem>>, vector<1x2x32xf32>,
    %c0_175 = arith.constant 0 : index
    %c0_176 = arith.constant 0 : index
    %476 = vector.load %arg0[%c0_175, %c0_176] : memref<2x16xf32, #tpu.memory_space<vmem>>, vector<2x16xf32>
    %477 = arith.truncf %476 : vector<2x16xf32> to vector<2x16xbf16>
    %c128 = arith.constant 128 : index
    %c0_177 = arith.constant 0 : index
    %478 = vector.load %arg4[%c128, %c0_177] : memref<432x128xbf16, #tpu.memory_space<vmem>>, vector<16x128xbf16>
    %cst_178 = arith.constant dense<0.000000e+00> : vector<2x128xf32>
    %479 = tpu.matmul %477, %478, %cst_178 {dimension_numbers = #tpu.dot_dimension_numbers<[1], [0], [0], [1], [0, 0, 1, 1], [], []>} : vector<2x16xbf16>, vector<16x128xbf16>, vector<2x128xf32> -> vector<2x128xf32>
    %480 = arith.truncf %463 : vector<2x32xf32> to vector<2x32xbf16>
    %c144 = arith.constant 144 : index
    %c0_179 = arith.constant 0 : index
    %481 = vector.load %arg4[%c144, %c0_179] : memref<432x128xbf16, #tpu.memory_space<vmem>>, vector<32x128xbf16>
    %cst_180 = arith.constant dense<0.000000e+00> : vector<2x128xf32>
    %482 = tpu.matmul %480, %481, %cst_180 {dimension_numbers = #tpu.dot_dimension_numbers<[1], [0], [0], [1], [0, 0, 1, 1], [], []>} : vector<2x32xbf16>, vector<32x128xbf16>, vector<2x128xf32> -> vector<2x128xf32>
    %483 = arith.addf %479, %482 : vector<2x128xf32>
    %c2_181 = arith.constant 2 : index
    %c0_182 = arith.constant 0 : index
    %484 = vector.load %arg5[%c2_181, %c0_182] : memref<8x128xf32, #tpu.memory_space<vmem>>, vector<1x128xf32>
    %485 = vector.broadcast %484 : vector<1x128xf32> to vector<2x128xf32>
    %486 = arith.addf %483, %485 : vector<2x128xf32>
    %cst_183 = arith.constant 0.000000e+00 : f32
    %487 = vector.broadcast %cst_183 : f32 to vector<2x128xf32>
    %488 = arith.maximumf %486, %487 : vector<2x128xf32>
    %489 = arith.truncf %488 : vector<2x128xf32> to vector<2x128xbf16>
    %c176 = arith.constant 176 : index
    %c0_184 = arith.constant 0 : index
    %490 = vector.load %arg4[%c176, %c0_184] : memref<432x128xbf16, #tpu.memory_space<vmem>>, vector<128x128xbf16>
    %cst_185 = arith.constant dense<0.000000e+00> : vector<2x128xf32>
    %491 = tpu.matmul %489, %490, %cst_185 {dimension_numbers = #tpu.dot_dimension_numbers<[1], [0], [0], [1], [0, 0, 1, 1], [], []>} : vector<2x128xbf16>, vector<128x128xbf16>, vector<2x128xf32> -> vector<2x128xf32>
    %c3_186 = arith.constant 3 : index
    %c0_187 = arith.constant 0 : index
    %492 = vector.load %arg5[%c3_186, %c0_187] : memref<8x128xf32, #tpu.memory_space<vmem>>, vector<1x128xf32>
    %493 = vector.broadcast %492 : vector<1x128xf32> to vector<2x128xf32>
    %494 = arith.addf %491, %493 : vector<2x128xf32>
    %cst_188 = arith.constant 0.000000e+00 : f32
    %495 = vector.broadcast %cst_188 : f32 to vector<2x128xf32>
    %496 = arith.maximumf %494, %495 : vector<2x128xf32>
    %497 = arith.truncf %496 : vector<2x128xf32> to vector<2x128xbf16>
    %c304 = arith.constant 304 : index
    %c0_189 = arith.constant 0 : index
    %498 = vector.load %arg4[%c304, %c0_189] : memref<432x128xbf16, #tpu.memory_space<vmem>>, vector<128x128xbf16>
    %cst_190 = arith.constant dense<0.000000e+00> : vector<2x128xf32>
    %499 = tpu.matmul %497, %498, %cst_190 {dimension_numbers = #tpu.dot_dimension_numbers<[1], [0], [0], [1], [0, 0, 1, 1], [], []>} : vector<2x128xbf16>, vector<128x128xbf16>, vector<2x128xf32> -> vector<2x128xf32>
    %c4_191 = arith.constant 4 : index
    %c0_192 = arith.constant 0 : index
    %500 = vector.load %arg5[%c4_191, %c0_192] : memref<8x128xf32, #tpu.memory_space<vmem>>, vector<1x128xf32>
    %501 = vector.broadcast %500 : vector<1x128xf32> to vector<2x128xf32>
    %502 = arith.addf %499, %501 : vector<2x128xf32>
    %503 = math.tanh %502 : vector<2x128xf32>
    %504 = vector.extract_strided_slice %503 {offsets = [0, 0], sizes = [2, 16], strides = [1, 1]} : vector<2x128xf32> to vector<2x16xf32>
    %cst_193 = arith.constant 1.000000e-01 : f32
    %505 = vector.broadcast %cst_193 : f32 to vector<2x16xf32>
    %506 = arith.mulf %504, %505 : vector<2x16xf32>
    %c0_194 = arith.constant 0 : index
    %c0_195 = arith.constant 0 : index
    %507 = vector.load %arg6[%c0_194, %c0_195] : memref<2x16xf32, #tpu.memory_space<vmem>>, vector<2x16xf32>
    tpu.vector_store %arg6[%c0_194, %c0_195], %506 {strides = array<i32>} : memref<2x16xf32, #tpu.memory_space<vmem>>, vector<2x16xf32>,
    return
  }
}

</mosaic_0001>

<bundles_post_ra>
// kernel: update_network_forward.1
= control target key start
LH: loop header
LB: loop body
LE: loop exit
PB: predicated region body
PF: predicated region fallthrough
CT: control target
= control target key end

     0   :  { %14 = vsyncpa [#allocation4], 0  ;;  %s2471_s0 = inlined_call_operand.hbm [shape: f32[2,16], index: 0, kind: input, shape index: {}]   ;;  %s2472_s1 = inlined_call_operand.hbm [shape: f32[2,8,17], index: 1, kind: input, shape index: {}]   ;;  %s2473_s2 = inlined_call_operand.hbm [shape: f32[2,2,32], index: 2, kind: input, shape index: {}]   ;;  %s2474_s3 = inlined_call_operand.hbm [shape: f32[2,2,32], index: 3, kind: input, shape index: {}]   ;;  %s2475_s4 = inlined_call_operand.hbm [shape: bf16[432,128], index: 4, kind: input, shape index: {}]   ;;  %s2476_s5 = inlined_call_operand.hbm [shape: f32[8,128], index: 5, kind: input, shape index: {}]   ;;  %s2477_s6 = inlined_call_operand.hbm [shape: f32[2,16], index: 6, kind: output, shape index: {0}]   ;;  %s2478_s7 = inlined_call_operand.hbm [shape: f32[2,2,32], index: 7, kind: output, shape index: {1}]   ;;  %s2479_s8 = inlined_call_operand.hbm [shape: f32[2,2,32], index: 8, kind: output, shape index: {2}]  }
   0x1   :  { %15 = vsyncpa [#allocation7], 0 }
   0x2   :  { %16 = vsyncpa [#allocation10], 0 }
   0x3   :  { %17 = vsyncpa [#allocation13], 0 }
   0x4   :  { %18 = vsyncpa [#allocation5], 0  ;;  %s35_s29 = sshll.u32 %s2472_s1, 4  ;;  %s36_s29 = int_to_ptr.hbm [resolvable:$true] %s35_s29 }
   0x5   :  { %19 = vsyncpa [#allocation16], 0  ;;  %s2087_s30 = smov [#allocation6]   ;;  %s2088_s10 = smov 128  }
   0x6   :  { %s37_s9 = sshll.u32 %s2087_s30, 4  ;;  %s2089_s11 = smov 8   ;;  %s38_s9 = int_to_ptr.vmem [resolvable:$true] %s37_s9 }
   0x7   :  { %43 = dma.hbm_to_vmem [thread:$0]  %s36_s29, 256, %s38_s9, [#allocation7], %s2088_s10, %s2088_s10, %s2089_s11  }
   0x8   :  { %s61_s14 = sshll.u32 %s2474_s3, 4  ;;  %s2090_s15 = smov [#allocation9]   ;;  %s62_s14 = int_to_ptr.hbm [resolvable:$true] %s61_s14 }
   0x9   :  { %s63_s16 = sshll.u32 %s2090_s15, 4  ;;  %s25_s19 = sshll.u32 %s2471_s0, 4  ;;  %s64_s16 = int_to_ptr.vmem [resolvable:$true] %s63_s16  ;;  %s26_s19 = int_to_ptr.hbm [resolvable:$true] %s25_s19 }
   0xa   :  { %s2091_s1 = smov 32   ;;  %s2092_s20 = smov 2  }
   0xb   :  { %69 = dma.hbm_to_vmem [thread:$0]  %s62_s14, 64, %s64_s16, [#allocation10], %s2091_s1, %s2091_s1, %s2092_s20  }
   0xc   :  { %s48_s23 = sshll.u32 %s2473_s2, 4  ;;  %s2093_s3 = smov [#allocation3]   ;;  %s49_s23 = int_to_ptr.hbm [resolvable:$true] %s48_s23 }
   0xd   :  { %s27_s24 = sshll.u32 %s2093_s3, 4  ;;  %s2094_s25 = smov [#allocation8]   ;;  %s28_s24 = int_to_ptr.vmem [resolvable:$true] %s27_s24 }
   0xe   :  { %30 = dma.hbm_to_vmem [thread:$0]  %s26_s19, 32, %s28_s24, [#allocation4]  }
   0xf   :  { %s50_s26 = sshll.u32 %s2094_s25, 4  ;;  %s74_s28 = sshll.u32 %s2475_s4, 4  ;;  %s51_s26 = int_to_ptr.vmem [resolvable:$true] %s50_s26  ;;  %s75_s28 = int_to_ptr.hbm [resolvable:$true] %s74_s28 }
  0x10   :  { %56 = dma.hbm_to_vmem [thread:$0]  %s49_s23, 64, %s51_s26, [#allocation7], %s2091_s1, %s2091_s1, %s2092_s20  }
  0x11   :  { %s2095_s29 = smov [#allocation11]   ;;  %s88_s10 = sshll.u32 %s2476_s5, 4  ;;  %s89_s10 = int_to_ptr.hbm [resolvable:$true] %s88_s10 }
  0x12   :  { %s76_s30 = sshll.u32 %s2095_s29, 4  ;;  %s2096_s11 = smov 64   ;;  %s77_s30 = int_to_ptr.vmem [resolvable:$true] %s76_s30 }
  0x13   :  { %s2097_s12 = smov 4   ;;  %s2098_s4 = smov [#allocation12]  }
  0x14   :  { %82 = dma.hbm_to_vmem [thread:$0]  %s75_s28, 3456, %s77_s30, [#allocation10], %s2096_s11, %s2096_s11, %s2097_s12  }
  0x15   :  { %s90_s13 = sshll.u32 %s2098_s4, 4  ;;  %s91_s13 = int_to_ptr.vmem [resolvable:$true] %s90_s13 }
  0x16   :  { %93 = dma.hbm_to_vmem [thread:$0]  %s89_s10, 128, %s91_s13, [#allocation13]  }
  0x17   :  { %2075 = dma.done.wait [#allocation4], 32  }
  0x18   :  { %2076 = vsyncadd [#allocation4], 4294967264 }
  0x19   :  { %2077 = dma.done.wait [#allocation7], 320  }
  0x1a   :  { %2078 = vsyncadd [#allocation7], 4294966976 }
  0x1b   :  { %2079 = dma.done.wait [#allocation10], 3520  }
  0x1c   :  { %2080 = vsyncadd [#allocation10], 4294963776 }
  0x1d   :  { %2081 = dma.done.wait [#allocation13], 128  }
  0x1e   :  { %2082 = vsyncadd [#allocation13], 4294967168  ;;  %vm154_vm0 = vcmask 1040384   ;;  %v138_v0 = vld [vmem:[#allocation11 + $0x8] sm:$0x1]  ;;  %v2175_v2 = vld [vmem:[#allocation11 + $0x18] sm:$0xff] }
  0x1f   :  { %v146_v1 = vunpack.c.l.b16 %v138_v0  ;;  %v2099_v3 = vmov 0   ;;  %v177_v5 = vld [vmem:[#allocation9] sm:$0x3]  ;;  %371 = vmatpush.bf16.msra.mxu0 %v2175_v2  ;;  %v2178_v9 = vld [vmem:[#allocation11 + $0x10] sm:$0xff]  ;;  %v1718_v10 = vld [vmem:[#allocation11] sm:$0xff]  ;;  %vm150_vm1 = vcmask 138240  }
  0x20   :  { %v156_v4 = vsel %vm154_vm0, 65535, %v2099_v3  ;;  %v228_v7 = vrot.slane %v177_v5, 1  ;;  %v133_v11 = vld [vmem:[#allocation6] sm:$0xff]  ;;  %v134_v12 = vld [vmem:[#allocation6 + $0x8] sm:$0xff]  ;;  %v176_v14 = vld [vmem:[#allocation8] sm:$0x3] }
  0x21   :  { %v148_v6 = vpack.c.b16 %v146_v1, %v146_v1  ;;  %v135_v13 = vpack.c.bf16 %v134_v12, %v133_v11  ;;  %v185_v15 = vpack.c.bf16 %v176_v14, %v176_v14  ;;  %vm198_vm2 = vcmask 261120   ;;  %v1755_v16 = vld [vmem:[#allocation12] ss:$0 sm:$0xff]  ;;  %v2198_v48 = vld [vmem:[#allocation11 + $0x28] sm:$0xff]  ;;  %v2204_v50 = vld [vmem:[#allocation11 + $0x20] sm:$0xff]  ;;  %s2100_s5 = smov 96  }
  0x22   :  { %231 = vrot.lane.b32.xlu1 %v228_v7, %s2091_s1  ;;  %v2200_v49 = vld [vmem:[#allocation11 + $0x38] sm:$0xff]  ;;  %302 = vmatpush.bf16.msra.mxu2 %v2198_v48  ;;  %v2206_v51 = vld [vmem:[#allocation11 + $0x30] sm:$0xff]  ;;  %vm276_vm3 = vcmask 1041409   ;;  %vm1272_vm4 = vcmask 254976   ;;  %vm1340_vm5 = vcmask 130048   ;;  %s1543_s16 = sshll.u32 %s2478_s7, 4  ;;  %s1544_s16 = int_to_ptr.hbm [resolvable:$true] %s1543_s16 }
  0x23   :  { %v158_v8 = vand.u32 %v156_v4, %v148_v6  ;;  %372 = vmatpush.bf16.msra.mxu0 %v2178_v9  ;;  %330 = vmatpush.bf16.msra.mxu3 %v2200_v49  ;;  %v179_v63 = vld [vmem:[#allocation8 + $0x2] sm:$0x3]  ;;  %v2231_v12 = vld [vmem:[#allocation12 + $0x1] ss:$0 sm:$0xff]  ;;  %s2101_s17 = smov [#allocation15]   ;;  %s1556_s22 = sshll.u32 %s2479_s8, 4  ;;  %s1557_s22 = int_to_ptr.hbm [resolvable:$true] %s1556_s22 }
  0x24   :  { %v182_v0 = vpack.c.bf16 %v179_v63, %v179_v63  ;;  %s1541_s18 = sshll.u32 %s2101_s17, 4  ;;  %s2102_s23 = smov [#allocation17]   ;;  %vm1524_vm6 = vcmask 123904   ;;  %s1542_s18 = int_to_ptr.vmem [resolvable:$true] %s1541_s18 }
  0x25   :  { %166 = vmatpush.bf16.msra.mxu1 %v158_v8  ;;  %s1554_s3 = sshll.u32 %s2102_s23, 4  ;;  %s2103_s7 = smov [#allocation14]   ;;  %s1555_s3 = int_to_ptr.vmem [resolvable:$true] %s1554_s3 }
  0x26   :  { %303 = vmatpush.bf16.msra.mxu2 %v2204_v50  ;;  %s1531_s24 = sshll.u32 %s2103_s7, 4  ;;  %s1533_s0 = sshll.u32 %s2477_s6, 4  ;;  %s1532_s24 = int_to_ptr.vmem [resolvable:$true] %s1531_s24  ;;  %s1534_s0 = int_to_ptr.hbm [resolvable:$true] %s1533_s0 }
  0x27   :  { %573 = vmatpush.bf16.msrb.mxu0 %v2198_v48  ;;  %331 = vmatpush.bf16.msra.mxu3 %v2206_v51 }
  0x29   :  { %167 = vmatpush.bf16.msra.mxu1 %v1718_v10 }
  0x2a   :  { %229 = vrot.lane.b32.xlu1 %v177_v5, %s2091_s1  ;;  %463 = vmatpush.bf16.msrb.mxu2 %v2200_v49 }
  0x2b   :  { %500 = vmatpush.bf16.msrb.mxu3 %v2175_v2  ;;  %574 = vmatpush.bf16.msrb.mxu0 %v2204_v50 }
  0x2c   :  { %1585 = vmatmul.msk.bf16.vlgmr.msra.gmra.mxu1 %vm150_vm1, %v135_v13  ;;  %1612 = vmatmul.msk.bf16.vlgmr.msra.gmra.mxu3 %vm198_vm2, %v182_v0 }
  0x2d   :  { %208 = vmatpush.bf16.msrb.mxu1 %v2175_v2 }
  0x2e   :  { %464 = vmatpush.bf16.msrb.mxu2 %v2206_v51 }
  0x2f   :  { %501 = vmatpush.bf16.msrb.mxu3 %v2178_v9 }
  0x31   :  { %209 = vmatpush.bf16.msrb.mxu1 %v2178_v9 }
  0x33   :  { %702 = vmatpush.bf16.msra.mxu3 %v2198_v48 }
  0x35   :  { %444 = vmatpush.bf16.msra.mxu1 %v2198_v48 }
  0x37   :  { %703 = vmatpush.bf16.msra.mxu3 %v2204_v50 }
  0x39   :  { %445 = vmatpush.bf16.msra.mxu1 %v2204_v50 }
  0x3c   :  { %1594 = vmatmul.msk.bf16.vlgmr.msrb.gmra.mxu1 %vm198_vm2, %v185_v15 }
  0x3d   :  { %592 = vmatpush.bf16.msrb.mxu1 %v2200_v49 }
  0x41   :  { %593 = vmatpush.bf16.msrb.mxu1 %v2206_v51 }
  0x94   :  { %v232_v38 = vpop.permute.xlu1 %231 }
  0x9c   :  { %v230_v42 = vpop.permute.xlu1 %229 }
  0xa9   :  { %v169_v17 = vpop.f32.mrf.mxu1 }
  0xaa   :  { %v170_v18 = vadd.f32 %v1755_v16, %v169_v17 }
  0xac   :  { %174 = vst [vmem:[#allocation2] sm:$0xff] %v170_v18 }
  0xaf   :  { %v333_v3 = vpop.f32.mrf.mxu3 }
  0xb1   :  { %v171_v19 = vpop.f32.mrf.mxu1 }
  0xb2   :  { %v172_v20 = vadd.f32 %v1755_v16, %v171_v19 }
  0xb3   :  { %v183_v25 = vld [vmem:[#allocation2] sm:$0x1]  ;;  %v363_v5 = vld [vmem:[#allocation2 + $0x1] sm:$0x1] }
  0xb4   :  { %175 = vst [vmem:[#allocation2 + $0x8] sm:$0xff] %v172_v20 }
  0xb7   :  { %v335_v4 = vpop.f32.mrf.mxu3 }
  0xb9   :  { %v211_v21 = vpop.f32.mrf.mxu1 }
  0xba   :  { %v216_v22 = vrot.slane %v211_v21, 1  ;;  %v219_v27 = vadd.f32 %v211_v21, %v183_v25  ;;  %v181_v21 = vld [vmem:[#allocation9 + $0x2] sm:$0x3] }
  0xbb   :  { %v184_v23 = vld [vmem:[#allocation2 + $0x8] sm:$0x1]  ;;  %v364_v10 = vld [vmem:[#allocation2 + $0x9] sm:$0x1] }
  0xbc   :  { %v220_v24 = vadd.f32 %v216_v22, %v184_v23 }
  0xbe   :  { %1760 = vtanh.f32 %v220_v24 }
  0xbf   :  { %1762 = vtanh.f32 %v219_v27 }
  0xc1   :  { %v213_v26 = vpop.f32.mrf.mxu1 }
  0xc4   :  { %v1761_v28 = vpop.eup %1760 }
  0xc5   :  { %241 = vrot.lane.b32.xlu0 %v1761_v28, %s2096_s11  ;;  %v1763_v29 = vpop.eup %1762  ;;  %v224_v30 = vmul.f32 0.5, %v1761_v28 }
  0xc6   :  { %v223_v34 = vmul.f32 0.5, %v1763_v29 }
  0xc7   :  { %v226_v31 = vadd.f32 0.5, %v224_v30 }
  0xc8   :  { %v225_v35 = vadd.f32 0.5, %v223_v34 }
  0xc9   :  { %v236_v39 = vmul.f32 %v232_v38, %v226_v31 }
  0xca   :  { %v235_v43 = vmul.f32 %v230_v42, %v225_v35 }
  0xcd   :  { %239 = vrot.lane.b32.xlu0 %v1763_v29, %s2096_s11 }
 0x137   :  { %v242_v32 = vpop.permute.xlu0 %241 }
 0x138   :  { %v246_v33 = vmul.f32 %v242_v32, %v226_v31 }
 0x13a   :  { %251 = vrot.lane.b32.xlu2 %v246_v33, %s2091_s1 }
 0x13f   :  { %v240_v36 = vpop.permute.xlu0 %239 }
 0x140   :  { %v245_v37 = vmul.f32 %v240_v36, %v225_v35 }
 0x142   :  { %249 = vrot.lane.b32.xlu2 %v245_v37, %s2091_s1 }
 0x194   :  { %v252_v40 = vpop.permute.xlu2 %251 }
 0x195   :  { %v2190_v41 = vadd.f32 %v252_v40, %v236_v39 }
 0x197   :  { %1764 = vtanh.f32 %v2190_v41 }
 0x19c   :  { %v250_v44 = vpop.permute.xlu2 %249 }
 0x19d   :  { %v1765_v45 = vpop.eup %1764  ;;  %v2193_v46 = vadd.f32 %v250_v44, %v235_v43 }
 0x19e   :  { %263 = vrot.lane.b32.xlu0 %v1765_v45, %s2096_s11 }
 0x19f   :  { %1766 = vtanh.f32 %v2193_v46 }
 0x1a5   :  { %v1767_v47 = vpop.eup %1766 }
 0x1a6   :  { %261 = vrot.lane.b32.xlu1 %v1767_v47, %s2096_s11 }
 0x210   :  { %v264_v52 = vpop.permute.xlu0 %263 }
 0x211   :  { %v268_v53 = vmul.f32 %v264_v52, %v226_v31 }
 0x213   :  { %v270_v54 = vpack.c.bf16 %v268_v53, %v268_v53 }
 0x215   :  { %v274_v56 = vunpack.c.l.b16 %v270_v54 }
 0x217   :  { %v275_v59 = vrot.slane %v274_v56, 7 }
 0x218   :  { %v262_v55 = vpop.permute.xlu1 %261 }
 0x219   :  { %v267_v57 = vmul.f32 %v262_v55, %v225_v35 }
 0x21b   :  { %v269_v58 = vpack.c.bf16 %v267_v57, %v267_v57 }
 0x21d   :  { %v273_v60 = vunpack.c.l.b16 %v269_v58 }
 0x21f   :  { %v277_v61 = vsel %vm276_vm3, %v275_v59, %v273_v60 }
 0x220   :  { %v278_v62 = vpack.c.b16 %v277_v61, %v277_v61 }
 0x222   :  { %279 = vrot.lane.b32.xlu2 %v278_v62, %s2091_s1 }
 0x27c   :  { %v280_v1 = vpop.permute.xlu2 %279 }
 0x27d   :  { %1603 = vmatmul.msk.bf16.vlgmr.msra.gmra.mxu2 %vm198_vm2, %v280_v1  ;;  %1613 = vmatmul.msk.bf16.vlgmr.msra.gmra.mxu0 %vm198_vm2, %v280_v1 }
 0x27e   :  { %629 = vmatpush.bf16.msra.mxu2 %v2175_v2  ;;  %721 = vmatpush.bf16.msra.mxu0 %v2200_v49 }
 0x282   :  { %630 = vmatpush.bf16.msra.mxu2 %v2178_v9  ;;  %722 = vmatpush.bf16.msra.mxu0 %v2206_v51 }
 0x2fa   :  { %v374_v6 = vpop.f32.mrf.mxu0 }
 0x2fb   :  { %v379_v7 = vrot.slane %v374_v6, 1  ;;  %v382_v8 = vadd.f32 %v374_v6, %v363_v5  ;;  %v492_v5 = vld [vmem:[#allocation2 + $0x2] sm:$0x1] }
 0x2fd   :  { %v383_v11 = vadd.f32 %v379_v7, %v364_v10  ;;  %1768 = vtanh.f32 %v382_v8  ;;  %v493_v10 = vld [vmem:[#allocation2 + $0xa] sm:$0x1] }
 0x2ff   :  { %1770 = vtanh.f32 %v383_v11 }
 0x300   :  { %v305_v13 = vpop.f32.mrf.mxu2 }
 0x301   :  { %v334_v14 = vadd.f32 %v333_v3, %v305_v13 }
 0x302   :  { %v376_v15 = vpop.f32.mrf.mxu0 }
 0x303   :  { %v1769_v16 = vpop.eup %1768  ;;  %v337_v17 = vadd.f32 %v2231_v12, %v334_v14 }
 0x304   :  { %394 = vrot.lane.b32.xlu1 %v1769_v16, %s2096_s11  ;;  %v386_v22 = vmul.f32 0.5, %v1769_v16 }
 0x305   :  { %v1771_v18 = vpop.eup %1770  ;;  %1772 = vtanh.f32 %v337_v17 }
 0x306   :  { %396 = vrot.lane.b32.xlu0 %v1771_v18, %s2096_s11  ;;  %v387_v23 = vmul.f32 0.5, %v1771_v18  ;;  %v388_v24 = vadd.f32 0.5, %v386_v22 }
 0x308   :  { %v307_v19 = vpop.f32.mrf.mxu2  ;;  %v389_v27 = vadd.f32 0.5, %v387_v23  ;;  %v390_v38 = vmul.f32 %v388_v24, %v2193_v46 }
 0x30a   :  { %v391_v30 = vmul.f32 %v389_v27, %v2190_v41 }
 0x30b   :  { %v1773_v20 = vpop.eup %1772 }
 0x30c   :  { %347 = vrot.lane.b32.xlu1 %v1773_v20, %s2096_s11  ;;  %v339_v34 = vmul.f32 0.5, %v1773_v20 }
 0x30e   :  { %v340_v36 = vadd.f32 0.5, %v339_v34 }
 0x314   :  { %342 = vrot.lane.b32.xlu1 %v181_v21, %s2091_s1 }
 0x376   :  { %v395_v25 = vpop.permute.xlu1 %394 }
 0x377   :  { %v400_v26 = vmul.f32 %v395_v25, %v388_v24 }
 0x378   :  { %v397_v28 = vpop.permute.xlu0 %396 }
 0x379   :  { %v401_v29 = vmul.f32 %v397_v28, %v389_v27  ;;  %404 = vrot.lane.b32.xlu0 %v400_v26, %s2091_s1 }
 0x37b   :  { %406 = vrot.lane.b32.xlu2 %v401_v29, %s2091_s1 }
 0x37e   :  { %v348_v35 = vpop.permute.xlu1 %347 }
 0x37f   :  { %v350_v37 = vmul.f32 %v348_v35, %v340_v36 }
 0x386   :  { %v343_v43 = vpop.permute.xlu1 %342 }
 0x387   :  { %v345_v44 = vmul.f32 %v343_v43, %v340_v36 }
 0x3d5   :  { %v407_v31 = vpop.permute.xlu2 %406 }
 0x3d6   :  { %v2241_v32 = vadd.f32 %v407_v31, %v391_v30 }
 0x3d8   :  { %1774 = vtanh.f32 %v2241_v32 }
 0x3de   :  { %v1775_v33 = vpop.eup %1774 }
 0x3df   :  { %418 = vrot.lane.b32.xlu2 %v1775_v33, %s2096_s11 }
 0x3e7   :  { %352 = vrot.lane.b32.xlu2 %v350_v37, %s2091_s1 }
 0x3eb   :  { %v405_v39 = vpop.permute.xlu0 %404 }
 0x3ec   :  { %v2247_v40 = vadd.f32 %v405_v39, %v390_v38 }
 0x3ee   :  { %1776 = vtanh.f32 %v2247_v40 }
 0x3f4   :  { %v1777_v41 = vpop.eup %1776 }
 0x3f5   :  { %416 = vrot.lane.b32.xlu0 %v1777_v41, %s2096_s11 }
 0x439   :  { %v419_v42 = vpop.permute.xlu2 %418 }
 0x43a   :  { %v423_v46 = vmul.f32 %v419_v42, %v389_v27 }
 0x43c   :  { %v425_v53 = vpack.c.bf16 %v423_v46, %v423_v46 }
 0x43e   :  { %v429_v55 = vunpack.c.l.b16 %v425_v53 }
 0x440   :  { %v430_v58 = vrot.slane %v429_v55, 7 }
 0x441   :  { %v353_v45 = vpop.permute.xlu2 %352 }
 0x442   :  { %v2251_v47 = vadd.f32 %v353_v45, %v345_v44 }
 0x444   :  { %1778 = vtanh.f32 %v2251_v47 }
 0x44a   :  { %v1779_v52 = vpop.eup %1778 }
 0x44b   :  { %358 = vrot.lane.b32.xlu1 %v1779_v52, %s2096_s11 }
 0x467   :  { %v417_v54 = vpop.permute.xlu0 %416 }
 0x468   :  { %v422_v56 = vmul.f32 %v417_v54, %v388_v24 }
 0x46a   :  { %v424_v57 = vpack.c.bf16 %v422_v56, %v422_v56 }
 0x46c   :  { %v428_v59 = vunpack.c.l.b16 %v424_v57 }
 0x46e   :  { %v431_v60 = vsel %vm276_vm3, %v430_v58, %v428_v59 }
 0x46f   :  { %v432_v61 = vpack.c.b16 %v431_v60, %v431_v60 }
 0x471   :  { %433 = vrot.lane.b32.xlu0 %v432_v61, %s2091_s1 }
 0x4bd   :  { %v359_v62 = vpop.permute.xlu1 %358 }
 0x4be   :  { %v361_v63 = vmul.f32 %v359_v62, %v340_v36 }
 0x4c0   :  { %v362_v0 = vpack.c.bf16 %v361_v63, %v361_v63 }
 0x4c2   :  { %452 = vrot.lane.b32.xlu2 %v362_v0, %s2091_s1 }
 0x4e3   :  { %v434_v1 = vpop.permute.xlu0 %433 }
 0x4e4   :  { %1614 = vmatmul.msk.bf16.vlgmr.msra.gmra.mxu1 %vm198_vm2, %v434_v1  ;;  %1616 = vmatmul.msk.bf16.vlgmr.msrb.gmra.mxu3 %vm198_vm2, %v434_v1 }
 0x4e5   :  { %758 = vmatpush.bf16.msra.mxu1 %v2175_v2  ;;  %850 = vmatpush.bf16.msrb.mxu3 %v2200_v49 }
 0x4e9   :  { %759 = vmatpush.bf16.msra.mxu1 %v2178_v9  ;;  %851 = vmatpush.bf16.msrb.mxu3 %v2206_v51 }
 0x51c   :  { %v453_v3 = vpop.permute.xlu2 %452 }
 0x51d   :  { %1615 = vmatmul.msk.bf16.vlgmr.msrb.gmra.mxu2 %vm198_vm2, %v453_v3 }
 0x51e   :  { %831 = vmatpush.bf16.msrb.mxu2 %v2198_v48 }
 0x522   :  { %832 = vmatpush.bf16.msrb.mxu2 %v2204_v50 }
 0x561   :  { %v447_v4 = vpop.f32.mrf.mxu1 }
 0x567   :  { %v503_v6 = vpop.f32.mrf.mxu3 }
 0x568   :  { %v508_v7 = vrot.slane %v503_v6, 1  ;;  %v511_v8 = vadd.f32 %v503_v6, %v492_v5 }
 0x569   :  { %v449_v11 = vpop.f32.mrf.mxu1 }
 0x56a   :  { %v512_v13 = vadd.f32 %v508_v7, %v493_v10  ;;  %1780 = vtanh.f32 %v511_v8  ;;  %v622_v8 = vld [vmem:[#allocation2 + $0xb] sm:$0x1] }
 0x56c   :  { %1782 = vtanh.f32 %v512_v13 }
 0x56f   :  { %v505_v14 = vpop.f32.mrf.mxu3 }
 0x570   :  { %v1781_v15 = vpop.eup %1780 }
 0x571   :  { %523 = vrot.lane.b32.xlu1 %v1781_v15, %s2096_s11  ;;  %v515_v22 = vmul.f32 0.5, %v1781_v15 }
 0x572   :  { %v1783_v16 = vpop.eup %1782 }
 0x573   :  { %525 = vrot.lane.b32.xlu0 %v1783_v16, %s2096_s11  ;;  %v516_v23 = vmul.f32 0.5, %v1783_v16  ;;  %v517_v24 = vadd.f32 0.5, %v515_v22 }
 0x575   :  { %v518_v27 = vadd.f32 0.5, %v516_v23  ;;  %v519_v39 = vmul.f32 %v517_v24, %v2247_v40 }
 0x577   :  { %v520_v35 = vmul.f32 %v518_v27, %v2241_v32 }
 0x5a0   :  { %v466_v17 = vpop.f32.mrf.mxu2 }
 0x5a1   :  { %v467_v18 = vadd.f32 %v466_v17, %v447_v4  ;;  %v621_v4 = vld [vmem:[#allocation2 + $0x3] sm:$0x1] }
 0x5a3   :  { %v470_v19 = vadd.f32 %v2231_v12, %v467_v18 }
 0x5a5   :  { %1784 = vtanh.f32 %v470_v19 }
 0x5a8   :  { %v468_v20 = vpop.f32.mrf.mxu2 }
 0x5ab   :  { %v1785_v21 = vpop.eup %1784 }
 0x5ac   :  { %476 = vrot.lane.b32.xlu1 %v1785_v21, %s2096_s11  ;;  %v472_v30 = vmul.f32 0.5, %v1785_v21 }
 0x5ae   :  { %v473_v31 = vadd.f32 0.5, %v472_v30 }
 0x5b0   :  { %v474_v32 = vmul.f32 %v473_v31, %v2251_v47 }
 0x5e3   :  { %v524_v25 = vpop.permute.xlu1 %523 }
 0x5e4   :  { %v529_v26 = vmul.f32 %v524_v25, %v517_v24 }
 0x5e5   :  { %v526_v28 = vpop.permute.xlu0 %525 }
 0x5e6   :  { %v530_v29 = vmul.f32 %v526_v28, %v518_v27  ;;  %533 = vrot.lane.b32.xlu0 %v529_v26, %s2091_s1 }
 0x5e8   :  { %535 = vrot.lane.b32.xlu2 %v530_v29, %s2091_s1 }
 0x61e   :  { %v477_v33 = vpop.permute.xlu1 %476 }
 0x61f   :  { %v479_v34 = vmul.f32 %v477_v33, %v473_v31 }
 0x621   :  { %481 = vrot.lane.b32.xlu1 %v479_v34, %s2091_s1 }
 0x642   :  { %v536_v36 = vpop.permute.xlu2 %535 }
 0x643   :  { %v2275_v37 = vadd.f32 %v536_v36, %v520_v35 }
 0x645   :  { %1786 = vtanh.f32 %v2275_v37 }
 0x64b   :  { %v1787_v38 = vpop.eup %1786 }
 0x64c   :  { %547 = vrot.lane.b32.xlu2 %v1787_v38, %s2096_s11 }
 0x658   :  { %v534_v41 = vpop.permute.xlu0 %533 }
 0x659   :  { %v2280_v42 = vadd.f32 %v534_v41, %v519_v39 }
 0x65b   :  { %1788 = vtanh.f32 %v2280_v42 }
 0x661   :  { %v1789_v43 = vpop.eup %1788 }
 0x662   :  { %545 = vrot.lane.b32.xlu0 %v1789_v43, %s2096_s11 }
 0x693   :  { %v482_v44 = vpop.permute.xlu1 %481 }
 0x694   :  { %v2285_v45 = vadd.f32 %v482_v44, %v474_v32 }
 0x696   :  { %1790 = vtanh.f32 %v2285_v45 }
 0x69c   :  { %v1791_v52 = vpop.eup %1790 }
 0x69d   :  { %487 = vrot.lane.b32.xlu0 %v1791_v52, %s2096_s11 }
 0x6a6   :  { %v548_v46 = vpop.permute.xlu2 %547 }
 0x6a7   :  { %v552_v40 = vmul.f32 %v548_v46, %v518_v27 }
 0x6a9   :  { %v554_v53 = vpack.c.bf16 %v552_v40, %v552_v40 }
 0x6ab   :  { %v558_v55 = vunpack.c.l.b16 %v554_v53 }
 0x6ad   :  { %v559_v58 = vrot.slane %v558_v55, 7 }
 0x6d4   :  { %v546_v54 = vpop.permute.xlu0 %545 }
 0x6d5   :  { %v551_v56 = vmul.f32 %v546_v54, %v517_v24 }
 0x6d7   :  { %v553_v57 = vpack.c.bf16 %v551_v56, %v551_v56 }
 0x6d9   :  { %v557_v59 = vunpack.c.l.b16 %v553_v57 }
 0x6db   :  { %v560_v60 = vsel %vm276_vm3, %v559_v58, %v557_v59 }
 0x6dc   :  { %v561_v47 = vpack.c.b16 %v560_v60, %v560_v60 }
 0x6de   :  { %562 = vrot.lane.b32.xlu2 %v561_v47, %s2091_s1 }
 0x70f   :  { %v488_v61 = vpop.permute.xlu0 %487 }
 0x710   :  { %v490_v62 = vmul.f32 %v488_v61, %v473_v31 }
 0x712   :  { %v491_v63 = vpack.c.bf16 %v490_v62, %v490_v62 }
 0x714   :  { %581 = vrot.lane.b32.xlu1 %v491_v63, %s2091_s1 }
 0x738   :  { %v563_v0 = vpop.permute.xlu2 %562 }
 0x739   :  { %1617 = vmatmul.msk.bf16.vlgmr.msrb.gmra.mxu0 %vm198_vm2, %v563_v0  ;;  %1619 = vmatmul.msk.bf16.vlgmr.msra.gmra.mxu2 %vm198_vm2, %v563_v0 }
 0x73a   :  { %887 = vmatpush.bf16.msrb.mxu0 %v2175_v2  ;;  %979 = vmatpush.bf16.msra.mxu2 %v2200_v49 }
 0x73e   :  { %888 = vmatpush.bf16.msrb.mxu0 %v2178_v9  ;;  %980 = vmatpush.bf16.msra.mxu2 %v2206_v51 }
 0x786   :  { %v582_v1 = vpop.permute.xlu1 %581 }
 0x787   :  { %1618 = vmatmul.msk.bf16.vlgmr.msrb.gmra.mxu1 %vm198_vm2, %v582_v1  ;;  %v750_v1 = vld [vmem:[#allocation2 + $0x4] sm:$0x1] }
 0x788   :  { %960 = vmatpush.bf16.msrb.mxu1 %v2198_v48 }
 0x78c   :  { %961 = vmatpush.bf16.msrb.mxu1 %v2204_v50 }
 0x7b6   :  { %v576_v3 = vpop.f32.mrf.mxu0 }
 0x7bc   :  { %v632_v5 = vpop.f32.mrf.mxu2 }
 0x7bd   :  { %v637_v6 = vrot.slane %v632_v5, 1  ;;  %v640_v7 = vadd.f32 %v632_v5, %v621_v4 }
 0x7be   :  { %v578_v10 = vpop.f32.mrf.mxu0 }
 0x7bf   :  { %v641_v11 = vadd.f32 %v637_v6, %v622_v8  ;;  %1792 = vtanh.f32 %v640_v7  ;;  %v751_v6 = vld [vmem:[#allocation2 + $0xc] sm:$0x1] }
 0x7c1   :  { %1794 = vtanh.f32 %v641_v11 }
 0x7c4   :  { %v634_v13 = vpop.f32.mrf.mxu2 }
 0x7c5   :  { %v1793_v14 = vpop.eup %1792 }
 0x7c6   :  { %652 = vrot.lane.b32.xlu0 %v1793_v14, %s2096_s11  ;;  %v644_v25 = vmul.f32 0.5, %v1793_v14 }
 0x7c7   :  { %v1795_v15 = vpop.eup %1794 }
 0x7c8   :  { %654 = vrot.lane.b32.xlu2 %v1795_v15, %s2096_s11  ;;  %v645_v21 = vmul.f32 0.5, %v1795_v15  ;;  %v646_v26 = vadd.f32 0.5, %v644_v25 }
 0x7ca   :  { %v647_v22 = vadd.f32 0.5, %v645_v21  ;;  %v648_v39 = vmul.f32 %v646_v26, %v2280_v42 }
 0x7cc   :  { %v649_v30 = vmul.f32 %v647_v22, %v2275_v37 }
 0x804   :  { %v595_v16 = vpop.f32.mrf.mxu1 }
 0x805   :  { %v596_v17 = vadd.f32 %v595_v16, %v576_v3 }
 0x807   :  { %v599_v18 = vadd.f32 %v2231_v12, %v596_v17 }
 0x809   :  { %1796 = vtanh.f32 %v599_v18 }
 0x80c   :  { %v597_v19 = vpop.f32.mrf.mxu1 }
 0x80f   :  { %v1797_v20 = vpop.eup %1796 }
 0x810   :  { %605 = vrot.lane.b32.xlu1 %v1797_v20, %s2096_s11  ;;  %v601_v29 = vmul.f32 0.5, %v1797_v20 }
 0x812   :  { %v602_v34 = vadd.f32 0.5, %v601_v29 }
 0x814   :  { %v603_v32 = vmul.f32 %v602_v34, %v2285_v45 }
 0x822   :  { %v655_v23 = vpop.permute.xlu2 %654 }
 0x823   :  { %v659_v24 = vmul.f32 %v655_v23, %v647_v22 }
 0x825   :  { %664 = vrot.lane.b32.xlu2 %v659_v24, %s2091_s1 }
 0x838   :  { %v653_v27 = vpop.permute.xlu0 %652 }
 0x839   :  { %v658_v28 = vmul.f32 %v653_v27, %v646_v26 }
 0x83b   :  { %662 = vrot.lane.b32.xlu0 %v658_v28, %s2091_s1 }
 0x87f   :  { %v665_v31 = vpop.permute.xlu2 %664 }
 0x880   :  { %v2308_v33 = vadd.f32 %v665_v31, %v649_v30 }
 0x882   :  { %1798 = vtanh.f32 %v2308_v33  ;;  %v606_v35 = vpop.permute.xlu1 %605 }
 0x883   :  { %v608_v36 = vmul.f32 %v606_v35, %v602_v34 }
 0x885   :  { %610 = vrot.lane.b32.xlu1 %v608_v36, %s2091_s1 }
 0x888   :  { %v1799_v38 = vpop.eup %1798 }
 0x889   :  { %676 = vrot.lane.b32.xlu2 %v1799_v38, %s2096_s11 }
 0x8ad   :  { %v663_v41 = vpop.permute.xlu0 %662 }
 0x8ae   :  { %v2314_v43 = vadd.f32 %v663_v41, %v648_v39 }
 0x8b0   :  { %1800 = vtanh.f32 %v2314_v43 }
 0x8b6   :  { %v1801_v37 = vpop.eup %1800 }
 0x8b7   :  { %674 = vrot.lane.b32.xlu0 %v1801_v37, %s2096_s11 }
 0x8e3   :  { %v677_v40 = vpop.permute.xlu2 %676 }
 0x8e4   :  { %v681_v42 = vmul.f32 %v677_v40, %v647_v22 }
 0x8e6   :  { %v683_v53 = vpack.c.bf16 %v681_v42, %v681_v42 }
 0x8e8   :  { %v687_v55 = vunpack.c.l.b16 %v683_v53 }
 0x8ea   :  { %v688_v58 = vrot.slane %v687_v55, 7 }
 0x8f7   :  { %v611_v44 = vpop.permute.xlu1 %610 }
 0x8f8   :  { %v2319_v52 = vadd.f32 %v611_v44, %v603_v32 }
 0x8fa   :  { %1802 = vtanh.f32 %v2319_v52 }
 0x900   :  { %v1803_v46 = vpop.eup %1802 }
 0x901   :  { %616 = vrot.lane.b32.xlu1 %v1803_v46, %s2096_s11 }
 0x929   :  { %v675_v54 = vpop.permute.xlu0 %674 }
 0x92a   :  { %v680_v56 = vmul.f32 %v675_v54, %v646_v26 }
 0x92c   :  { %v682_v57 = vpack.c.bf16 %v680_v56, %v680_v56 }
 0x92e   :  { %v686_v59 = vunpack.c.l.b16 %v682_v57 }
 0x930   :  { %v689_v60 = vsel %vm276_vm3, %v688_v58, %v686_v59 }
 0x931   :  { %v690_v45 = vpack.c.b16 %v689_v60, %v689_v60 }
 0x933   :  { %691 = vrot.lane.b32.xlu2 %v690_v45, %s2091_s1 }
 0x973   :  { %v617_v47 = vpop.permute.xlu1 %616 }
 0x974   :  { %v619_v61 = vmul.f32 %v617_v47, %v602_v34 }
 0x976   :  { %v620_v62 = vpack.c.bf16 %v619_v61, %v619_v61 }
 0x978   :  { %710 = vrot.lane.b32.xlu0 %v620_v62, %s2091_s1 }
 0x98d   :  { %v692_v63 = vpop.permute.xlu2 %691 }
 0x98e   :  { %1620 = vmatmul.msk.bf16.vlgmr.msra.gmra.mxu3 %vm198_vm2, %v692_v63  ;;  %1622 = vmatmul.msk.bf16.vlgmr.msra.gmra.mxu1 %vm198_vm2, %v692_v63 }
 0x98f   :  { %1016 = vmatpush.bf16.msra.mxu3 %v2175_v2  ;;  %1108 = vmatpush.bf16.msra.mxu1 %v2200_v49 }
 0x993   :  { %1017 = vmatpush.bf16.msra.mxu3 %v2178_v9  ;;  %1109 = vmatpush.bf16.msra.mxu1 %v2206_v51 }
 0x9ea   :  { %v711_v0 = vpop.permute.xlu0 %710 }
 0x9eb   :  { %1621 = vmatmul.msk.bf16.vlgmr.msra.gmra.mxu0 %vm198_vm2, %v711_v0  ;;  %v879_v0 = vld [vmem:[#allocation2 + $0x5] sm:$0x1] }
 0x9ec   :  { %1089 = vmatpush.bf16.msra.mxu0 %v2198_v48 }
 0x9f0   :  { %1090 = vmatpush.bf16.msra.mxu0 %v2204_v50 }
 0xa0b   :  { %v761_v3 = vpop.f32.mrf.mxu1 }
 0xa0c   :  { %v766_v4 = vrot.slane %v761_v3, 1  ;;  %v769_v5 = vadd.f32 %v761_v3, %v750_v1 }
 0xa0e   :  { %v770_v7 = vadd.f32 %v766_v4, %v751_v6  ;;  %1804 = vtanh.f32 %v769_v5  ;;  %v880_v5 = vld [vmem:[#allocation2 + $0xd] sm:$0x1] }
 0xa10   :  { %1806 = vtanh.f32 %v770_v7 }
 0xa11   :  { %v705_v8 = vpop.f32.mrf.mxu3 }
 0xa13   :  { %v763_v10 = vpop.f32.mrf.mxu1 }
 0xa14   :  { %v1805_v11 = vpop.eup %1804 }
 0xa15   :  { %781 = vrot.lane.b32.xlu2 %v1805_v11, %s2096_s11  ;;  %v773_v17 = vmul.f32 0.5, %v1805_v11 }
 0xa16   :  { %v1807_v13 = vpop.eup %1806 }
 0xa17   :  { %783 = vrot.lane.b32.xlu1 %v1807_v13, %s2096_s11  ;;  %v775_v19 = vadd.f32 0.5, %v773_v17  ;;  %v774_v24 = vmul.f32 0.5, %v1807_v13 }
 0xa19   :  { %v707_v14 = vpop.f32.mrf.mxu3  ;;  %v776_v25 = vadd.f32 0.5, %v774_v24  ;;  %v777_v28 = vmul.f32 %v775_v19, %v2314_v43 }
 0xa1b   :  { %v778_v39 = vmul.f32 %v776_v25, %v2308_v33 }
 0xa68   :  { %v724_v15 = vpop.f32.mrf.mxu0 }
 0xa69   :  { %v725_v16 = vadd.f32 %v724_v15, %v705_v8 }
 0xa6b   :  { %v728_v18 = vadd.f32 %v2231_v12, %v725_v16 }
 0xa6d   :  { %1808 = vtanh.f32 %v728_v18 }
 0xa6f   :  { %v782_v20 = vpop.permute.xlu2 %781 }
 0xa70   :  { %v787_v21 = vmul.f32 %v782_v20, %v775_v19  ;;  %v726_v22 = vpop.f32.mrf.mxu0 }
 0xa72   :  { %791 = vrot.lane.b32.xlu2 %v787_v21, %s2091_s1 }
 0xa73   :  { %v1809_v23 = vpop.eup %1808 }
 0xa74   :  { %734 = vrot.lane.b32.xlu0 %v1809_v23, %s2096_s11  ;;  %v730_v34 = vmul.f32 0.5, %v1809_v23 }
 0xa76   :  { %v731_v35 = vadd.f32 0.5, %v730_v34 }
 0xa78   :  { %v732_v32 = vmul.f32 %v731_v35, %v2319_v52 }
 0xa89   :  { %v784_v26 = vpop.permute.xlu1 %783 }
 0xa8a   :  { %v788_v27 = vmul.f32 %v784_v26, %v776_v25 }
 0xa8c   :  { %793 = vrot.lane.b32.xlu1 %v788_v27, %s2091_s1 }
 0xacc   :  { %v792_v29 = vpop.permute.xlu2 %791 }
 0xacd   :  { %v2342_v30 = vadd.f32 %v792_v29, %v777_v28 }
 0xacf   :  { %1810 = vtanh.f32 %v2342_v30 }
 0xad5   :  { %v1811_v31 = vpop.eup %1810 }
 0xad6   :  { %803 = vrot.lane.b32.xlu2 %v1811_v31, %s2096_s11 }
 0xae6   :  { %v735_v36 = vpop.permute.xlu0 %734 }
 0xae7   :  { %v737_v38 = vmul.f32 %v735_v36, %v731_v35 }
 0xae9   :  { %739 = vrot.lane.b32.xlu0 %v737_v38, %s2091_s1 }
 0xafe   :  { %v794_v41 = vpop.permute.xlu1 %793 }
 0xaff   :  { %v2348_v37 = vadd.f32 %v794_v41, %v778_v39 }
 0xb01   :  { %1812 = vtanh.f32 %v2348_v37 }
 0xb07   :  { %v1813_v43 = vpop.eup %1812 }
 0xb08   :  { %805 = vrot.lane.b32.xlu1 %v1813_v43, %s2096_s11 }
 0xb30   :  { %v804_v42 = vpop.permute.xlu2 %803 }
 0xb31   :  { %v809_v33 = vmul.f32 %v804_v42, %v775_v19 }
 0xb33   :  { %v811_v55 = vpack.c.bf16 %v809_v33, %v809_v33 }
 0xb35   :  { %v815_v58 = vunpack.c.l.b16 %v811_v55 }
 0xb5b   :  { %v740_v44 = vpop.permute.xlu0 %739 }
 0xb5c   :  { %v2353_v46 = vadd.f32 %v740_v44, %v732_v32 }
 0xb5e   :  { %1814 = vtanh.f32 %v2353_v46 }
 0xb64   :  { %v1815_v40 = vpop.eup %1814 }
 0xb65   :  { %745 = vrot.lane.b32.xlu0 %v1815_v40, %s2096_s11 }
 0xb7a   :  { %v806_v53 = vpop.permute.xlu1 %805 }
 0xb7b   :  { %v810_v54 = vmul.f32 %v806_v53, %v776_v25 }
 0xb7d   :  { %v812_v56 = vpack.c.bf16 %v810_v54, %v810_v54 }
 0xb7f   :  { %v816_v57 = vunpack.c.l.b16 %v812_v56 }
 0xb81   :  { %v817_v59 = vrot.slane %v816_v57, 7 }
 0xb83   :  { %v818_v60 = vsel %vm276_vm3, %v817_v59, %v815_v58 }
 0xb84   :  { %v819_v52 = vpack.c.b16 %v818_v60, %v818_v60 }
 0xb86   :  { %820 = vrot.lane.b32.xlu1 %v819_v52, %s2091_s1 }
 0xbd7   :  { %v746_v45 = vpop.permute.xlu0 %745 }
 0xbd8   :  { %v748_v47 = vmul.f32 %v746_v45, %v731_v35 }
 0xbda   :  { %v749_v61 = vpack.c.bf16 %v748_v47, %v748_v47 }
 0xbdc   :  { %839 = vrot.lane.b32.xlu2 %v749_v61, %s2091_s1 }
 0xbf8   :  { %v821_v62 = vpop.permute.xlu1 %820 }
 0xbf9   :  { %1623 = vmatmul.msk.bf16.vlgmr.msrb.gmra.mxu2 %vm198_vm2, %v821_v62  ;;  %1625 = vmatmul.msk.bf16.vlgmr.msrb.gmra.mxu0 %vm198_vm2, %v821_v62  ;;  %v1008_v62 = vld [vmem:[#allocation2 + $0x6] sm:$0x1] }
 0xbfa   :  { %1145 = vmatpush.bf16.msrb.mxu2 %v2175_v2  ;;  %1237 = vmatpush.bf16.msrb.mxu0 %v2200_v49 }
 0xbfe   :  { %1146 = vmatpush.bf16.msrb.mxu2 %v2178_v9  ;;  %1238 = vmatpush.bf16.msrb.mxu0 %v2206_v51 }
 0xc36   :  { %v840_v63 = vpop.permute.xlu2 %839 }
 0xc37   :  { %1624 = vmatmul.msk.bf16.vlgmr.msrb.gmra.mxu3 %vm198_vm2, %v840_v63 }
 0xc38   :  { %1218 = vmatpush.bf16.msrb.mxu3 %v2198_v48 }
 0xc3c   :  { %1219 = vmatpush.bf16.msrb.mxu3 %v2204_v50 }
 0xc76   :  { %v890_v1 = vpop.f32.mrf.mxu0 }
 0xc77   :  { %v895_v3 = vrot.slane %v890_v1, 1  ;;  %v898_v4 = vadd.f32 %v890_v1, %v879_v0 }
 0xc79   :  { %v899_v6 = vadd.f32 %v895_v3, %v880_v5  ;;  %1816 = vtanh.f32 %v898_v4  ;;  %v1009_v3 = vld [vmem:[#allocation2 + $0xe] sm:$0x1] }
 0xc7b   :  { %1818 = vtanh.f32 %v899_v6 }
 0xc7c   :  { %v834_v2 = vpop.f32.mrf.mxu2 }
 0xc7e   :  { %v892_v49 = vpop.f32.mrf.mxu0 }
 0xc7f   :  { %v1817_v9 = vpop.eup %1816 }
 0xc80   :  { %910 = vrot.lane.b32.xlu1 %v1817_v9, %s2096_s11  ;;  %v902_v13 = vmul.f32 0.5, %v1817_v9 }
 0xc81   :  { %v1819_v51 = vpop.eup %1818 }
 0xc82   :  { %912 = vrot.lane.b32.xlu0 %v1819_v51, %s2096_s11  ;;  %v903_v14 = vmul.f32 0.5, %v1819_v51  ;;  %v904_v15 = vadd.f32 0.5, %v902_v13 }
 0xc84   :  { %v836_v7 = vpop.f32.mrf.mxu2  ;;  %v905_v18 = vadd.f32 0.5, %v903_v14  ;;  %v906_v25 = vmul.f32 %v904_v15, %v2342_v30 }
 0xc86   :  { %v907_v28 = vmul.f32 %v905_v18, %v2348_v37 }
 0xcba   :  { %v853_v48 = vpop.f32.mrf.mxu3 }
 0xcbb   :  { %v854_v8 = vadd.f32 %v853_v48, %v834_v2 }
 0xcbd   :  { %v857_v50 = vadd.f32 %v2231_v12, %v854_v8 }
 0xcbf   :  { %1820 = vtanh.f32 %v857_v50 }
 0xcc2   :  { %v855_v10 = vpop.f32.mrf.mxu3 }
 0xcc5   :  { %v1821_v11 = vpop.eup %1820 }
 0xcc6   :  { %863 = vrot.lane.b32.xlu2 %v1821_v11, %s2096_s11  ;;  %v859_v21 = vmul.f32 0.5, %v1821_v11 }
 0xcc8   :  { %v860_v22 = vadd.f32 0.5, %v859_v21 }
 0xcca   :  { %v861_v30 = vmul.f32 %v860_v22, %v2353_v46 }
 0xcf2   :  { %v911_v16 = vpop.permute.xlu1 %910 }
 0xcf3   :  { %v916_v17 = vmul.f32 %v911_v16, %v904_v15 }
 0xcf4   :  { %v913_v19 = vpop.permute.xlu0 %912 }
 0xcf5   :  { %v917_v20 = vmul.f32 %v913_v19, %v905_v18  ;;  %920 = vrot.lane.b32.xlu1 %v916_v17, %s2091_s1 }
 0xcf7   :  { %922 = vrot.lane.b32.xlu0 %v917_v20, %s2091_s1 }
 0xd20   :  { %v864_v23 = vpop.permute.xlu2 %863 }
 0xd21   :  { %v866_v24 = vmul.f32 %v864_v23, %v860_v22 }
 0xd23   :  { %868 = vrot.lane.b32.xlu2 %v866_v24, %s2091_s1 }
 0xd67   :  { %v921_v26 = vpop.permute.xlu1 %920 }
 0xd68   :  { %v2377_v27 = vadd.f32 %v921_v26, %v906_v25 }
 0xd69   :  { %v923_v29 = vpop.permute.xlu0 %922 }
 0xd6a   :  { %1822 = vtanh.f32 %v2377_v27  ;;  %v2381_v31 = vadd.f32 %v923_v29, %v907_v28 }
 0xd6c   :  { %1824 = vtanh.f32 %v2381_v31 }
 0xd70   :  { %v1823_v34 = vpop.eup %1822 }
 0xd71   :  { %932 = vrot.lane.b32.xlu1 %v1823_v34, %s2096_s11 }
 0xd72   :  { %v1825_v35 = vpop.eup %1824 }
 0xd73   :  { %934 = vrot.lane.b32.xlu0 %v1825_v35, %s2096_s11 }
 0xd7d   :  { %v869_v36 = vpop.permute.xlu2 %868 }
 0xd7e   :  { %v2387_v38 = vadd.f32 %v869_v36, %v861_v30 }
 0xd80   :  { %1826 = vtanh.f32 %v2387_v38 }
 0xd86   :  { %v1827_v39 = vpop.eup %1826 }
 0xd87   :  { %874 = vrot.lane.b32.xlu2 %v1827_v39, %s2096_s11 }
 0xde1   :  { %v875_v41 = vpop.permute.xlu2 %874 }
 0xde2   :  { %v877_v37 = vmul.f32 %v875_v41, %v860_v22 }
 0xde3   :  { %v933_v43 = vpop.permute.xlu1 %932 }
 0xde4   :  { %v878_v32 = vpack.c.bf16 %v877_v37, %v877_v37  ;;  %v938_v44 = vmul.f32 %v933_v43, %v904_v15 }
 0xde5   :  { %v935_v40 = vpop.permute.xlu0 %934 }
 0xde6   :  { %v939_v42 = vmul.f32 %v935_v40, %v905_v18  ;;  %968 = vrot.lane.b32.xlu1 %v878_v32, %s2091_s1  ;;  %v940_v33 = vpack.c.bf16 %v938_v44, %v938_v44 }
 0xde8   :  { %v941_v53 = vpack.c.bf16 %v939_v42, %v939_v42  ;;  %v944_v54 = vunpack.c.l.b16 %v940_v33 }
 0xdea   :  { %v945_v46 = vunpack.c.l.b16 %v941_v53 }
 0xdec   :  { %v946_v55 = vrot.slane %v945_v46, 7 }
 0xdee   :  { %v947_v56 = vsel %vm276_vm3, %v946_v55, %v944_v54  ;;  %v1137_v54 = vld [vmem:[#allocation2 + $0x7] sm:$0x1] }
 0xdef   :  { %v948_v57 = vpack.c.b16 %v947_v56, %v947_v56 }
 0xdf1   :  { %949 = vrot.lane.b32.xlu0 %v948_v57, %s2091_s1 }
 0xe58   :  { %v969_v58 = vpop.permute.xlu1 %968 }
 0xe59   :  { %1627 = vmatmul.msk.bf16.vlgmr.msra.gmra.mxu2 %vm198_vm2, %v969_v58  ;;  %v1138_v58 = vld [vmem:[#allocation2 + $0xf] sm:$0x1] }
 0xe63   :  { %v950_v59 = vpop.permute.xlu0 %949 }
 0xe64   :  { %1626 = vmatmul.msk.bf16.vlgmr.msrb.gmra.mxu1 %vm198_vm2, %v950_v59  ;;  %1628 = vmatmul.msk.bf16.vlgmr.msra.gmra.mxu3 %vm198_vm2, %v950_v59 }
 0xedc   :  { %v982_v60 = vpop.f32.mrf.mxu2 }
 0xee1   :  { %v963_v52 = vpop.f32.mrf.mxu1 }
 0xee2   :  { %v983_v45 = vadd.f32 %v982_v60, %v963_v52 }
 0xee4   :  { %v986_v47 = vadd.f32 %v2231_v12, %v983_v45  ;;  %v984_v61 = vpop.f32.mrf.mxu2 }
 0xee6   :  { %1828 = vtanh.f32 %v986_v47 }
 0xee7   :  { %v1019_v63 = vpop.f32.mrf.mxu3 }
 0xee8   :  { %v1024_v0 = vrot.slane %v1019_v63, 1  ;;  %v1027_v1 = vadd.f32 %v1019_v63, %v1008_v62 }
 0xee9   :  { %v965_v4 = vpop.f32.mrf.mxu1 }
 0xeea   :  { %v1028_v5 = vadd.f32 %v1024_v0, %v1009_v3  ;;  %1830 = vtanh.f32 %v1027_v1 }
 0xeec   :  { %v1829_v6 = vpop.eup %1828  ;;  %1832 = vtanh.f32 %v1028_v5 }
 0xeed   :  { %992 = vrot.lane.b32.xlu1 %v1829_v6, %s2096_s11  ;;  %v988_v50 = vmul.f32 0.5, %v1829_v6 }
 0xeef   :  { %v1021_v2 = vpop.f32.mrf.mxu3  ;;  %v989_v10 = vadd.f32 0.5, %v988_v50 }
 0xef0   :  { %v1831_v49 = vpop.eup %1830 }
 0xef1   :  { %1039 = vrot.lane.b32.xlu0 %v1831_v49, %s2096_s11  ;;  %v1031_v11 = vmul.f32 0.5, %v1831_v49  ;;  %v990_v22 = vmul.f32 %v989_v10, %v2387_v38 }
 0xef2   :  { %v1833_v9 = vpop.eup %1832 }
 0xef3   :  { %1041 = vrot.lane.b32.xlu2 %v1833_v9, %s2096_s11  ;;  %v1032_v51 = vmul.f32 0.5, %v1833_v9  ;;  %v1033_v15 = vadd.f32 0.5, %v1031_v11 }
 0xef5   :  { %v1034_v7 = vadd.f32 0.5, %v1032_v51  ;;  %v1035_v25 = vmul.f32 %v1033_v15, %v2377_v27 }
 0xef7   :  { %v1036_v18 = vmul.f32 %v1034_v7, %v2381_v31 }
 0xf4d   :  { %v1042_v48 = vpop.permute.xlu2 %1041 }
 0xf4e   :  { %v1046_v8 = vmul.f32 %v1042_v48, %v1034_v7 }
 0xf50   :  { %1051 = vrot.lane.b32.xlu2 %v1046_v8, %s2091_s1 }
 0xf5f   :  { %v993_v13 = vpop.permute.xlu1 %992 }
 0xf60   :  { %v995_v14 = vmul.f32 %v993_v13, %v989_v10 }
 0xf62   :  { %997 = vrot.lane.b32.xlu1 %v995_v14, %s2091_s1 }
 0xf63   :  { %v1040_v16 = vpop.permute.xlu0 %1039 }
 0xf64   :  { %v1045_v17 = vmul.f32 %v1040_v16, %v1033_v15 }
 0xf66   :  { %1049 = vrot.lane.b32.xlu0 %v1045_v17, %s2091_s1 }
 0xfaa   :  { %v1052_v19 = vpop.permute.xlu2 %1051 }
 0xfab   :  { %v2405_v20 = vadd.f32 %v1052_v19, %v1036_v18 }
 0xfad   :  { %1834 = vtanh.f32 %v2405_v20 }
 0xfb3   :  { %v1835_v21 = vpop.eup %1834 }
 0xfb4   :  { %1063 = vrot.lane.b32.xlu2 %v1835_v21, %s2096_s11 }
 0xfd4   :  { %v998_v23 = vpop.permute.xlu1 %997 }
 0xfd5   :  { %v2410_v24 = vadd.f32 %v998_v23, %v990_v22 }
 0xfd7   :  { %1836 = vtanh.f32 %v2410_v24 }
 0xfd8   :  { %v1050_v26 = vpop.permute.xlu0 %1049 }
 0xfd9   :  { %v2414_v28 = vadd.f32 %v1050_v26, %v1035_v25 }
 0xfdb   :  { %1838 = vtanh.f32 %v2414_v28 }
 0xfdd   :  { %v1837_v29 = vpop.eup %1836 }
 0xfde   :  { %1003 = vrot.lane.b32.xlu1 %v1837_v29, %s2096_s11 }
 0xfe1   :  { %v1839_v31 = vpop.eup %1838 }
 0xfe2   :  { %1061 = vrot.lane.b32.xlu0 %v1839_v31, %s2096_s11 }
0x100e   :  { %v1064_v34 = vpop.permute.xlu2 %1063 }
0x100f   :  { %v1068_v35 = vmul.f32 %v1064_v34, %v1034_v7 }
0x1011   :  { %v1070_v36 = vpack.c.bf16 %v1068_v35, %v1068_v35 }
0x1013   :  { %v1074_v37 = vunpack.c.l.b16 %v1070_v36 }
0x1015   :  { %v1075_v32 = vrot.slane %v1074_v37, 7 }
0x1050   :  { %v1004_v30 = vpop.permute.xlu1 %1003 }
0x1051   :  { %v1006_v38 = vmul.f32 %v1004_v30, %v989_v10 }
0x1053   :  { %v1007_v39 = vpack.c.bf16 %v1006_v38, %v1006_v38 }
0x1054   :  { %v1062_v41 = vpop.permute.xlu0 %1061 }
0x1055   :  { %v1067_v27 = vmul.f32 %v1062_v41, %v1033_v15  ;;  %1097 = vrot.lane.b32.xlu0 %v1007_v39, %s2091_s1 }
0x1057   :  { %v1069_v43 = vpack.c.bf16 %v1067_v27, %v1067_v27 }
0x1059   :  { %v1073_v44 = vunpack.c.l.b16 %v1069_v43 }
0x105b   :  { %v1076_v40 = vsel %vm276_vm3, %v1075_v32, %v1073_v44 }
0x105c   :  { %v1077_v42 = vpack.c.b16 %v1076_v40, %v1076_v40 }
0x105e   :  { %1078 = vrot.lane.b32.xlu2 %v1077_v42, %s2091_s1 }
0x10b8   :  { %v1079_v33 = vpop.permute.xlu2 %1078 }
0x10b9   :  { %1629 = vmatmul.msk.bf16.vlgmr.msra.gmra.mxu0 %vm198_vm2, %v1079_v33  ;;  %1631 = vmatmul.msk.bf16.vlgmr.msrb.gmra.mxu2 %vm198_vm2, %v1079_v33  ;;  %v1858_v33 = vld [vmem:[#allocation12 + $0x1] ss:$0 sm:$0xff] }
0x10c7   :  { %v1098_v53 = vpop.permute.xlu0 %1097 }
0x10c8   :  { %1630 = vmatmul.msk.bf16.vlgmr.msra.gmra.mxu1 %vm198_vm2, %v1098_v53 }
0x1136   :  { %v1092_v46 = vpop.f32.mrf.mxu0 }
0x113c   :  { %v1148_v55 = vpop.f32.mrf.mxu2 }
0x113d   :  { %v1153_v56 = vrot.slane %v1148_v55, 1  ;;  %v1156_v57 = vadd.f32 %v1148_v55, %v1137_v54 }
0x113e   :  { %v1094_v59 = vpop.f32.mrf.mxu0 }
0x113f   :  { %v1157_v60 = vadd.f32 %v1153_v56, %v1138_v58  ;;  %1840 = vtanh.f32 %v1156_v57 }
0x1141   :  { %1842 = vtanh.f32 %v1157_v60 }
0x1144   :  { %v1150_v52 = vpop.f32.mrf.mxu2 }
0x1145   :  { %v1841_v45 = vpop.eup %1840  ;;  %v1111_v47 = vpop.f32.mrf.mxu1 }
0x1146   :  { %v1112_v61 = vadd.f32 %v1111_v47, %v1092_v46  ;;  %1168 = vrot.lane.b32.xlu2 %v1841_v45, %s2096_s11  ;;  %v1160_v3 = vmul.f32 0.5, %v1841_v45 }
0x1147   :  { %v1843_v62 = vpop.eup %1842 }
0x1148   :  { %v1115_v63 = vadd.f32 %v2231_v12, %v1112_v61  ;;  %1170 = vrot.lane.b32.xlu1 %v1843_v62, %s2096_s11  ;;  %v1162_v4 = vadd.f32 0.5, %v1160_v3  ;;  %v1161_v2 = vmul.f32 0.5, %v1843_v62 }
0x114a   :  { %1844 = vtanh.f32 %v1115_v63  ;;  %v1163_v49 = vadd.f32 0.5, %v1161_v2  ;;  %v1164_v50 = vmul.f32 %v1162_v4, %v2414_v28 }
0x114c   :  { %v1165_v14 = vmul.f32 %v1163_v49, %v2405_v20 }
0x114d   :  { %v1113_v0 = vpop.f32.mrf.mxu1 }
0x1150   :  { %v1845_v1 = vpop.eup %1844 }
0x1151   :  { %1121 = vrot.lane.b32.xlu0 %v1845_v1, %s2096_s11  ;;  %v1117_v12 = vmul.f32 0.5, %v1845_v1 }
0x1153   :  { %v1118_v7 = vadd.f32 0.5, %v1117_v12  ;;  %v1728_v12 = vld [vmem:[#allocation11 + $0x88] sm:$0xff] }
0x1155   :  { %v1119_v19 = vmul.f32 %v1118_v7, %v2410_v24 }
0x11a0   :  { %v1169_v5 = vpop.permute.xlu2 %1168 }
0x11a1   :  { %v1174_v6 = vmul.f32 %v1169_v5, %v1162_v4  ;;  %v1721_v5 = vld [vmem:[#allocation11 + $0x50] sm:$0xff] }
0x11a2   :  { %1327 = vmatpush.bf16.msrb.mxu1 %v1721_v5 }
0x11a3   :  { %1178 = vrot.lane.b32.xlu2 %v1174_v6, %s2091_s1  ;;  %v1294_v6 = vld [vmem:[#allocation3] sm:$0x3] }
0x11a4   :  { %v1295_v2 = vpack.c.bf16 %v1294_v6, %v1294_v6 }
0x11ba   :  { %v1171_v9 = vpop.permute.xlu1 %1170 }
0x11bb   :  { %v1175_v51 = vmul.f32 %v1171_v9, %v1163_v49 }
0x11bd   :  { %1180 = vrot.lane.b32.xlu1 %v1175_v51, %s2091_s1  ;;  %v1729_v51 = vld [vmem:[#allocation11 + $0x90] sm:$0xff] }
0x11be   :  { %1428 = vmatpush.bf16.msra.mxu3 %v1729_v51 }
0x11c2   :  { %1429 = vmatpush.bf16.msra.mxu3 %v1728_v12 }
0x11c3   :  { %v1122_v48 = vpop.permute.xlu0 %1121 }
0x11c4   :  { %v1124_v8 = vmul.f32 %v1122_v48, %v1118_v7  ;;  %v1726_v48 = vld [vmem:[#allocation11 + $0x78] sm:$0xff] }
0x11c6   :  { %1126 = vrot.lane.b32.xlu0 %v1124_v8, %s2091_s1 }
0x11fd   :  { %v1179_v10 = vpop.permute.xlu2 %1178 }
0x11fe   :  { %v1184_v11 = vadd.f32 %v1179_v10, %v1164_v50  ;;  %v1725_v10 = vld [vmem:[#allocation11 + $0x70] sm:$0xff] }
0x1200   :  { %1846 = vtanh.f32 %v1184_v11 }
0x1206   :  { %v1847_v13 = vpop.eup %1846 }
0x1207   :  { %1190 = vrot.lane.b32.xlu2 %v1847_v13, %s2096_s11 }
0x122f   :  { %v1181_v15 = vpop.permute.xlu1 %1180 }
0x1230   :  { %v1185_v16 = vadd.f32 %v1181_v15, %v1165_v14  ;;  %v1723_v15 = vld [vmem:[#allocation11 + $0x60] sm:$0xff] }
0x1232   :  { %1848 = vtanh.f32 %v1185_v16  ;;  %v1282_v17 = vrot.slane %v1185_v16, 7  ;;  %v1722_v16 = vld [vmem:[#allocation11 + $0x58] sm:$0xff] }
0x1234   :  { %v1283_v18 = vsel %vm276_vm3, %v1282_v17, %v1184_v11  ;;  %v1724_v11 = vld [vmem:[#allocation11 + $0x68] sm:$0xff]  ;;  %v1737_v17 = vld [vmem:[#allocation11 + $0xd0] sm:$0xff] }
0x1235   :  { %1509 = vmatpush.bf16.msra.mxu0 %v1737_v17 }
0x1238   :  { %v1849_v21 = vpop.eup %1848  ;;  %v1127_v22 = vpop.permute.xlu0 %1126 }
0x1239   :  { %v1129_v23 = vadd.f32 %v1127_v22, %v1119_v19  ;;  %1192 = vrot.lane.b32.xlu1 %v1849_v21, %s2096_s11  ;;  %v1735_v19 = vld [vmem:[#allocation11 + $0xc0] sm:$0xff]  ;;  %v1734_v21 = vld [vmem:[#allocation11 + $0xb8] sm:$0xff]  ;;  %v1733_v22 = vld [vmem:[#allocation11 + $0xb0] sm:$0xff] }
0x123b   :  { %1850 = vtanh.f32 %v1129_v23 }
0x1241   :  { %v1851_v25 = vpop.eup %1850 }
0x1242   :  { %1132 = vrot.lane.b32.xlu0 %v1851_v25, %s2096_s11  ;;  %v1757_v25 = vld [vmem:[#allocation12 + $0x2] ss:$0 sm:$0xff] }
0x1261   :  { %v1191_v26 = vpop.permute.xlu2 %1190 }
0x1262   :  { %v1196_v28 = vmul.f32 %v1191_v26, %v1162_v4  ;;  %v1719_v4 = vld [vmem:[#allocation11 + $0x40] sm:$0xff] }
0x1263   :  { %1351 = vmatpush.bf16.msra.mxu2 %v1719_v4 }
0x1264   :  { %v1198_v31 = vpack.c.bf16 %v1196_v28, %v1196_v28 }
0x1266   :  { %v1202_v30 = vunpack.c.l.b16 %v1198_v31  ;;  %1647 = vmatmul.msk.bf16.vlgmr.msra.gmra.mxu2 %vm1340_vm5, %v1295_v2 }
0x12ab   :  { %v1193_v20 = vpop.permute.xlu1 %1192 }
0x12ac   :  { %v1197_v29 = vmul.f32 %v1193_v20, %v1163_v49  ;;  %v1720_v49 = vld [vmem:[#allocation11 + $0x48] sm:$0xff] }
0x12ad   :  { %1328 = vmatpush.bf16.msrb.mxu1 %v1720_v49 }
0x12ae   :  { %v1199_v34 = vpack.c.bf16 %v1197_v29, %v1197_v29  ;;  %v1267_v59 = vrot.slane %v1197_v29, 7 }
0x12b0   :  { %v1203_v35 = vunpack.c.l.b16 %v1199_v34  ;;  %v1268_v60 = vsel %vm276_vm3, %v1267_v59, %v1196_v28 }
0x12b2   :  { %v1204_v36 = vrot.slane %v1203_v35, 7  ;;  %v1731_v35 = vld [vmem:[#allocation11 + $0xa0] sm:$0xff] }
0x12b4   :  { %v1133_v38 = vpop.permute.xlu0 %1132  ;;  %v1205_v24 = vsel %vm276_vm3, %v1204_v36, %v1202_v30  ;;  %v1730_v30 = vld [vmem:[#allocation11 + $0x98] sm:$0xff] }
0x12b5   :  { %v1135_v39 = vmul.f32 %v1133_v38, %v1118_v7  ;;  %v1206_v41 = vpack.c.b16 %v1205_v24, %v1205_v24  ;;  %v1727_v7 = vld [vmem:[#allocation11 + $0x80] sm:$0xff]  ;;  %v1758_v36 = vld [vmem:[#allocation12 + $0x3] ss:$0 sm:$0xff] }
0x12b6   :  { %1430 = vmatpush.bf16.msra.mxu3 %v1727_v7 }
0x12b7   :  { %v1136_v37 = vpack.c.bf16 %v1135_v39, %v1135_v39  ;;  %1207 = vrot.lane.b32.xlu1 %v1206_v41, %s2091_s1 }
0x12b9   :  { %1226 = vrot.lane.b32.xlu2 %v1136_v37, %s2091_s1 }
0x12ba   :  { %1431 = vmatpush.bf16.msra.mxu3 %v1726_v48 }
0x12be   :  { %1432 = vmatpush.bf16.msra.mxu3 %v1725_v10 }
0x12c2   :  { %1433 = vmatpush.bf16.msra.mxu3 %v1724_v11 }
0x12c6   :  { %1434 = vmatpush.bf16.msra.mxu3 %v1723_v15 }
0x12ca   :  { %1435 = vmatpush.bf16.msra.mxu3 %v1722_v16 }
0x12e9   :  { %v1353_v13 = vpop.f32.mrf.mxu2 }
0x12f1   :  { %v1355_v14 = vpop.f32.mrf.mxu2 }
0x1313   :  { %v1227_v27 = vpop.permute.xlu2 %1226 }
0x1314   :  { %1633 = vmatmul.msk.bf16.vlgmr.msrb.gmra.mxu0 %vm198_vm2, %v1227_v27  ;;  %v1759_v27 = vld [vmem:[#allocation12 + $0x4] ss:$0 sm:$0xff] }
0x1329   :  { %v1208_v43 = vpop.permute.xlu1 %1207 }
0x132a   :  { %1632 = vmatmul.msk.bf16.vlgmr.msrb.gmra.mxu3 %vm198_vm2, %v1208_v43 }
0x1391   :  { %v1240_v32 = vpop.f32.mrf.mxu0 }
0x1399   :  { %v1242_v44 = vpop.f32.mrf.mxu0 }
0x13ad   :  { %v1221_v40 = vpop.f32.mrf.mxu3 }
0x13ae   :  { %v1241_v42 = vadd.f32 %v1240_v32, %v1221_v40 }
0x13b0   :  { %v1244_v53 = vadd.f32 %v1858_v33, %v1241_v42 }
0x13b2   :  { %1852 = vtanh.f32 %v1244_v53 }
0x13b5   :  { %v1223_v46 = vpop.f32.mrf.mxu3 }
0x13b8   :  { %v1853_v54 = vpop.eup %1852 }
0x13b9   :  { %1250 = vrot.lane.b32.xlu0 %v1853_v54, %s2096_s11  ;;  %v1246_v55 = vmul.f32 0.5, %v1853_v54 }
0x13bb   :  { %v1247_v56 = vadd.f32 0.5, %v1246_v55 }
0x13bd   :  { %v1248_v52 = vmul.f32 %v1247_v56, %v1129_v23  ;;  %v1732_v23 = vld [vmem:[#allocation11 + $0xa8] sm:$0xff] }
0x142b   :  { %v1251_v57 = vpop.permute.xlu0 %1250 }
0x142c   :  { %v1253_v58 = vmul.f32 %v1251_v57, %v1247_v56 }
0x142e   :  { %1255 = vrot.lane.b32.xlu1 %v1253_v58, %s2091_s1 }
0x1436   :  { %1269 = vrot.lane.b32.xlu1 %v1268_v60, %s2091_s1 }
0x14a0   :  { %v1256_v45 = vpop.permute.xlu1 %1255 }
0x14a1   :  { %v1258_v47 = vadd.f32 %v1256_v45, %v1248_v52 }
0x14a3   :  { %1854 = vtanh.f32 %v1258_v47  ;;  %1289 = vrot.lane.b32.xlu1 %v1258_v47, %s2100_s5 }
0x14a8   :  { %v1270_v61 = vpop.permute.xlu1 %1269 }
0x14a9   :  { %v1855_v62 = vpop.eup %1854  ;;  %1273 = vst.msk [vmem:[#allocation15] sm:$0x3] %vm1272_vm4, %v1270_v61 }
0x14aa   :  { %1261 = vrot.lane.b32.xlu2 %v1855_v62, %s2096_s11 }
0x1504   :  { %v1262_v63 = vpop.permute.xlu2 %1261 }
0x1505   :  { %v1264_v0 = vmul.f32 %v1262_v63, %v1247_v56 }
0x1507   :  { %1275 = vrot.lane.b32.xlu2 %v1264_v0, %s2091_s1  ;;  %v1298_v1 = vpack.c.bf16 %v1264_v0, %v1264_v0 }
0x1509   :  { %1304 = vrot.lane.b32.xlu0 %v1298_v1, %s2091_s1 }
0x1511   :  { %1284 = vrot.lane.b32.xlu0 %v1283_v18, %s2100_s5  ;;  %v1736_v18 = vld [vmem:[#allocation11 + $0xc8] sm:$0xff] }
0x1512   :  { %1510 = vmatpush.bf16.msra.mxu0 %v1736_v18 }
0x1515   :  { %v1290_v3 = vpop.permute.xlu1 %1289 }
0x1516   :  { %1293 = vst.msk [vmem:[#allocation17 + $0x2] sm:$0x3] %vm1272_vm4, %v1290_v3  ;;  %1511 = vmatpush.bf16.msra.mxu0 %v1735_v19 }
0x151a   :  { %1512 = vmatpush.bf16.msra.mxu0 %v1734_v21 }
0x151e   :  { %1513 = vmatpush.bf16.msra.mxu0 %v1733_v22 }
0x1522   :  { %1514 = vmatpush.bf16.msra.mxu0 %v1732_v23 }
0x1526   :  { %1515 = vmatpush.bf16.msra.mxu0 %v1731_v35 }
0x152a   :  { %1516 = vmatpush.bf16.msra.mxu0 %v1730_v30 }
0x1561   :  { %v1276_v9 = vpop.permute.xlu2 %1275 }
0x1562   :  { %1279 = vst.msk [vmem:[#allocation15 + $0x2] sm:$0x3] %vm1272_vm4, %v1276_v9 }
0x1563   :  { %1549 = dma.vmem_to_hbm [thread:$0]  %s1542_s18, 64, %s1544_s16, [#allocation16], %s2091_s1, %s2091_s1, %s2092_s20  }
0x157b   :  { %v1305_v8 = vpop.permute.xlu0 %1304 }
0x157c   :  { %1642 = vmatmul.msk.bf16.vlgmr.msrb.gmra.mxu1 %vm198_vm2, %v1305_v8 }
0x1583   :  { %v1285_v50 = vpop.permute.xlu0 %1284 }
0x1584   :  { %1287 = vst.msk [vmem:[#allocation17] sm:$0x3] %vm1272_vm4, %v1285_v50 }
0x1585   :  { %1562 = dma.vmem_to_hbm [thread:$0]  %s1555_s3, 64, %s1557_s22, [#allocation16], %s2091_s1, %s2091_s1, %s2092_s20  }
0x15f9   :  { %v1330_v26 = vpop.f32.mrf.mxu1 }
0x15fa   :  { %v1354_v28 = vadd.f32 %v1353_v13, %v1330_v26 }
0x15fc   :  { %v1359_v20 = vadd.f32 %v1757_v25, %v1354_v28 }
0x15fe   :  { %v1360_v29 = vmax.f32 %v1359_v20, 0.0 }
0x1600   :  { %v1361_v31 = vpack.c.bf16 %v1360_v29, %v1360_v29 }
0x1601   :  { %v1332_v34 = vpop.f32.mrf.mxu1 }
0x1602   :  { %1436 = vmatmul.bf16.vlgmr.msra.gmra.mxu3 %v1361_v31 }
0x1685   :  { %v1437_v38 = vpop.f32.mrf.mxu3 }
0x1686   :  { %v1438_v24 = vadd.f32 %v1758_v36, %v1437_v38 }
0x1688   :  { %v1441_v39 = vmax.f32 %v1438_v24, 0.0 }
0x168a   :  { %v1442_v41 = vpack.c.bf16 %v1441_v39, %v1441_v39 }
0x168c   :  { %1517 = vmatmul.bf16.vlgmr.msra.gmra.mxu0 %v1442_v41 }
0x168d   :  { %v1439_v37 = vpop.f32.mrf.mxu3 }
0x1709   :  { %v1518_v43 = vpop.f32.mrf.mxu0 }
0x170a   :  { %v1519_v32 = vadd.f32 %v1759_v27, %v1518_v43 }
0x170c   :  { %1856 = vtanh.f32 %v1519_v32 }
0x1711   :  { %v1520_v44 = vpop.f32.mrf.mxu0 }
0x1712   :  { %v1857_v40 = vpop.eup %1856 }
0x1713   :  { %v1523_v42 = vmul.f32 0.1, %v1857_v40 }
0x1715   :  { %1525 = vst.msk [vmem:[#allocation14] sm:$0x3] %vm1524_vm6, %v1523_v42 }
0x1716   :  { %1536 = dma.vmem_to_hbm [thread:$0]  %s1532_s24, 32, %s1534_s0, [#allocation5]  }
0x1717   :  { %2083 = dma.done.wait [#allocation5], 32  }
0x1718   :  { %2084 = vsyncadd [#allocation5], 4294967264 }
0x1719   :  { %2085 = dma.done.wait [#allocation16], 128  }
0x171a   :  { %2086 = vsyncadd [#allocation16], 4294967168 }
0x171b   :  { %1575 = vsyncpa [#allocation4], 1 }
0x171c   :  { %1576 = vsyncpa [#allocation7], 1 }
0x171d   :  { %1577 = vsyncpa [#allocation10], 1 }
0x171e   :  { %1578 = vsyncpa [#allocation13], 1 }
0x171f   :  { %1579 = vsyncpa [#allocation5], 1 }
0x1720   :  { %1580 = vsyncpa [#allocation16], 1 }

</bundles_post_ra>
